<compile_context>
chip_gen: v6e
topology: v6e:2x2x1
jax: 0.10.0
libtpu: 0.0.40
codegen_flags: <defaults>
</compile_context>

<pallas_src>
import functools

import jax
import jax.numpy as jnp
from jax import lax
from jax.experimental import pallas as pl
from jax.experimental.pallas import tpu as pltpu


def _transformer_layer_kernel(
    x_ref,       # (1, N, C)  full sequence (query tile sliced out; K/V source), f32
    vecs_ref,    # (6, C)  rows: ln1_g, ln1_b, proj_b, ln2_g, ln2_b, fc2_b      f32
    b1_ref,      # (1, Hm) fc1 bias                                             f32
    wq_ref,      # (C, C)      to_queries                                       bf16
    wkv_ref,     # (C, 2C)     to_keys_values                                   bf16
    wp_ref,      # (C, C)      project                                          bf16
    w1_ref,      # (C, Hm)     mlp fc1                                          bf16
    w2_ref,      # (Hm, C)     mlp fc2                                          bf16
    o_ref,       # (1, TN, C)
    kv_sc,       # VMEM scratch (2, N, C) bf16 -- K / V, built once per batch
    *, num_heads, eps, tn,
):
    i = pl.program_id(1)
    n = x_ref.shape[1]
    c = x_ref.shape[2]
    hd = c // num_heads
    scale = hd ** (-0.5)

    vecs = vecs_ref[...]                     # (6, C) f32, hoisted once
    ln1_g, ln1_b = vecs[0:1], vecs[1:2]
    bp = vecs[2:3]
    ln2_g, ln2_b = vecs[3:4], vecs[4:5]
    b2 = vecs[5:6]

    def layernorm(v, g, b):
        mu = jnp.mean(v, axis=-1, keepdims=True)
        var = jnp.mean((v - mu) ** 2, axis=-1, keepdims=True)
        return (v - mu) * lax.rsqrt(var + eps) * g + b

    # ---- K / V projection: once per batch (grid axis 1 is "arbitrary") ----
    @pl.when(i == 0)
    def _():
        xkv = x_ref[0].astype(jnp.float32)                           # (N, C)
        xkv_n = layernorm(xkv, ln1_g, ln1_b).astype(jnp.bfloat16)
        kv_sc[0] = jnp.dot(xkv_n, wkv_ref[:, :c],
                           preferred_element_type=jnp.float32).astype(jnp.bfloat16)
        kv_sc[1] = jnp.dot(xkv_n, wkv_ref[:, c:],
                           preferred_element_type=jnp.float32).astype(jnp.bfloat16)

    # ---- Query / residual tile sliced out of the resident full-seq block ----
    start = pl.multiple_of(i * tn, tn)
    xq = x_ref[0, pl.ds(start, tn), :].astype(jnp.float32)           # (tn, C)

    xq_n = layernorm(xq, ln1_g, ln1_b).astype(jnp.bfloat16)
    q = jnp.dot(xq_n, wq_ref[...], preferred_element_type=jnp.float32) * scale
    q = q.astype(jnp.bfloat16).reshape(tn, num_heads, hd)            # (tn, H, hd)
    k = kv_sc[0].reshape(n, num_heads, hd)                           # (N,  H, hd)
    v = kv_sc[1].reshape(n, num_heads, hd)

    # ---- Multi-head attention, batched over the head axis ----
    s = lax.dot_general(q, k, (((2,), (2,)), ((1,), (1,))),
                        preferred_element_type=jnp.float32)          # (H, tn, N)
    s = s - jnp.max(s, axis=-1, keepdims=True)
    p = jnp.exp(s)
    denom = jnp.sum(p, axis=-1, keepdims=True)                       # (H, tn, 1)
    o_h = lax.dot_general(p.astype(jnp.bfloat16), v,
                          (((2,), (0,)), ((0,), (1,))),
                          preferred_element_type=jnp.float32)        # (H, tn, hd)
    # Normalize after the PV matmul (f32, EUP reciprocal).
    o_h = o_h * pl.reciprocal(denom, approx=True)
    attn = jnp.transpose(o_h, (1, 0, 2)).reshape(tn, c).astype(jnp.bfloat16)

    proj = jnp.dot(attn, wp_ref[...], preferred_element_type=jnp.float32) + bp
    x1 = xq + proj                                                   # residual 1

    # ---- LayerNorm2 + MLP (fc1 -> relu -> fc2), dropout = 0 => identity ----
    xn2 = layernorm(x1, ln2_g, ln2_b).astype(jnp.bfloat16)
    hm = w1_ref.shape[1]
    chunk = hm if (hm <= 1024 or hm % 512 != 0) else 512
    mlp = None
    for lo in range(0, hm, chunk):                                   # static loop
        hi = lo + chunk
        h1 = jnp.dot(xn2, w1_ref[:, lo:hi],
                     preferred_element_type=jnp.float32) + b1_ref[:, lo:hi]
        h1 = jnp.maximum(h1, 0.0).astype(jnp.bfloat16)
        part = jnp.dot(h1, w2_ref[lo:hi, :], preferred_element_type=jnp.float32)
        mlp = part if mlp is None else mlp + part
    mlp = mlp + b2

    o_ref[0] = (x1 + mlp).astype(o_ref.dtype)                        # residual 2


def transformer_layer(x, params, *, num_heads, eps=1e-5, block_n=None):
    """x: (B, N, C) float32.  params: dict of pre-transposed f32 weights."""
    B, N, C = x.shape
    assert C % num_heads == 0, "dim_self must be divisible by num_heads"
    Hm = params["w1"].shape[1]

    # Per-generation default query tile: 256 on v6e/v7x-class, 128 on v5e.
    if block_n is None:
        try:
            kind = jax.devices()[0].device_kind.lower()
        except Exception:
            kind = ""
        pref = 128 if ("v5 lite" in kind or "v5e" in kind) else 256
        if N > pref and N % pref == 0:
            block_n = pref
        elif N > 128 and N % 128 == 0:
            block_n = 128
        else:
            block_n = N
    assert N % block_n == 0 and (block_n == N or block_n % 8 == 0)
    tn = block_n
    n_tiles = N // tn

    # Pack the tiny per-channel vectors into one (6, C) input; cast matmul
    # weights to bf16 (halves VMEM residency and weight DMA traffic).
    vecs = jnp.concatenate(
        [params["ln1_g"], params["ln1_b"], params["bp"],
         params["ln2_g"], params["ln2_b"], params["b2"]], axis=0)      # (6, C)
    wq = params["wq"].astype(jnp.bfloat16)
    wkv = params["wkv"].astype(jnp.bfloat16)
    wp = params["wp"].astype(jnp.bfloat16)
    w1 = params["w1"].astype(jnp.bfloat16)
    w2 = params["w2"].astype(jnp.bfloat16)

    kernel = functools.partial(_transformer_layer_kernel,
                               num_heads=num_heads, eps=eps, tn=tn)

    def _call(single_buffer):
        buf_kw = dict(pipeline_mode=pl.Buffered(1)) if single_buffer else {}

        def const(shape):
            return pl.BlockSpec(shape,
                                lambda b, i, _s=shape: (0,) * len(_s),
                                **buf_kw)

        x_spec = pl.BlockSpec((1, N, C), lambda b, i: (b, 0, 0), **buf_kw)

        # Explicit scoped-VMEM budget, clamped to the physical capacity
        # (v7x has only 64 MiB per TensorCore) with ~8 MiB headroom.
        wbuf = 1 if single_buffer else 2
        weight_bytes = wbuf * 2 * (wq.size + wkv.size + wp.size + w1.size + w2.size)
        vec_bytes = wbuf * 4 * (6 * C + Hm)
        x_bytes = wbuf * 4 * N * C
        out_bytes = 2 * 4 * tn * C
        kv_bytes = 2 * 2 * N * C
        tmp_bytes = 4 * (num_heads * tn * N + 4 * tn * max(C, min(Hm, 1024)))
        need = (weight_bytes + vec_bytes + x_bytes + out_bytes
                + kv_bytes + tmp_bytes)
        try:
            cap = int(pltpu.get_tpu_info().vmem_capacity_bytes)
        except Exception:
            cap = 64 << 20
        vmem_limit = int(max(16 << 20,
                             min(cap - (8 << 20),
                                 max(32 << 20, need + (4 << 20)))))

        return pl.pallas_call(
            kernel,
            out_shape=jax.ShapeDtypeStruct((B, N, C), x.dtype),
            grid_spec=pltpu.PrefetchScalarGridSpec(
                num_scalar_prefetch=0,
                grid=(B, n_tiles),
                in_specs=[
                    x_spec,                 # full sequence (queries + K/V source)
                    const((6, C)),          # packed per-channel vectors
                    const((1, Hm)),         # fc1 bias
                    const((C, C)),          # Wq
                    const((C, 2 * C)),      # Wkv
                    const((C, C)),          # Wproj
                    const((C, Hm)),         # W1
                    const((Hm, C)),         # W2
                ],
                out_specs=pl.BlockSpec((1, tn, C), lambda b, i: (b, i, 0)),
                scratch_shapes=[pltpu.VMEM((2, N, C), jnp.bfloat16)],
            ),
            compiler_params=pltpu.CompilerParams(
                dimension_semantics=("parallel", "arbitrary"),
                vmem_limit_bytes=vmem_limit),
        )(x, vecs, params["b1"], wq, wkv, wp, w1, w2)

    try:
        return _call(True)
    except Exception:
        # Fallback if single-buffered pipeline_mode is not accepted on this jax.
        return _call(False)


def _reference(x, p, num_heads, eps=1e-5):
    """Pure-JAX f32 reference of the PyTorch forward (dropout=0, q/kv bias=False)."""
    def ln(v, g, b):
        mu = jnp.mean(v, -1, keepdims=True)
        var = jnp.mean((v - mu) ** 2, -1, keepdims=True)
        return (v - mu) / jnp.sqrt(var + eps) * g + b

    B, N, C = x.shape
    hd = C // num_heads
    xn = ln(x, p["ln1_g"][0], p["ln1_b"][0])
    q = (xn @ p["wq"]).reshape(B, N, num_heads, hd)
    kv = (xn @ p["wkv"]).reshape(B, N, 2, num_heads, hd)
    k, v = kv[:, :, 0], kv[:, :, 1]
    att = jnp.einsum("bnhd,bmhd->bnmh", q, k) * hd ** (-0.5)
    att = jax.nn.softmax(att, axis=2)
    out = jnp.einsum("bnmh,bmhd->bnhd", att, v).reshape(B, N, C)
    out = out @ p["wp"] + p["bp"][0]
    x = x + out
    xn2 = ln(x, p["ln2_g"][0], p["ln2_b"][0])
    h = jnp.maximum(xn2 @ p["w1"] + p["b1"][0], 0.0)
    return x + (h @ p["w2"] + p["b2"][0])


if __name__ == "__main__":
    B, N, C = 2, 8, 32
    NUM_HEADS = 4
    MLP_RATIO = 4.0
    HM = int(C * MLP_RATIO)

    key = jax.random.PRNGKey(0)
    ks = jax.random.split(key, 12)

    params = {
        "ln1_g": jnp.ones((1, C), jnp.float32),
        "ln1_b": jnp.zeros((1, C), jnp.float32),
        "wq": jax.random.normal(ks[0], (C, C), jnp.float32) * 0.05,
        "wkv": jax.random.normal(ks[1], (C, 2 * C), jnp.float32) * 0.05,
        "wp": jax.random.normal(ks[2], (C, C), jnp.float32) * 0.05,
        "bp": jax.random.normal(ks[3], (1, C), jnp.float32) * 0.01,
        "ln2_g": jnp.ones((1, C), jnp.float32),
        "ln2_b": jnp.zeros((1, C), jnp.float32),
        "w1": jax.random.normal(ks[4], (C, HM), jnp.float32) * 0.05,
        "b1": jax.random.normal(ks[5], (1, HM), jnp.float32) * 0.01,
        "w2": jax.random.normal(ks[6], (HM, C), jnp.float32) * 0.05,
        "b2": jax.random.normal(ks[7], (1, C), jnp.float32) * 0.01,
    }

    x = jax.random.normal(ks[8], (B, N, C), jnp.float32)

    out = jax.block_until_ready(transformer_layer(x, params, num_heads=NUM_HEADS))

    ref = _reference(x, params, NUM_HEADS)
    assert out.shape == (B, N, C)
    # bf16 MXU operands + approx reciprocal => relaxed tolerance vs f32 reference.
    assert jnp.allclose(out, ref, atol=2e-2, rtol=2e-2), "mismatch vs reference"

    print("KERNEL_OK")
</pallas_src>

<mosaic_0001>
module attributes {stable_mosaic.version = 11 : i64} {
  func.func @_transformer_layer_kernel(%arg0: i32, %arg1: i32, %arg2: memref<1x8x32xf32, #tpu.memory_space<vmem>>, %arg3: memref<6x32xf32, #tpu.memory_space<vmem>>, %arg4: memref<1x128xf32, #tpu.memory_space<vmem>>, %arg5: memref<32x32xbf16, #tpu.memory_space<vmem>>, %arg6: memref<32x64xbf16, #tpu.memory_space<vmem>>, %arg7: memref<32x32xbf16, #tpu.memory_space<vmem>>, %arg8: memref<32x128xbf16, #tpu.memory_space<vmem>>, %arg9: memref<128x32xbf16, #tpu.memory_space<vmem>>, %arg10: memref<1x8x32xf32, #tpu.memory_space<vmem>>, %arg11: memref<2x8x32xbf16, #tpu.memory_space<vmem>>) attributes {dimension_semantics = [#tpu.dimension_semantics<parallel>, #tpu.dimension_semantics<arbitrary>], iteration_bounds = array<i64: 2, 1>, scalar_prefetch = 0 : i64, scratch_operands = 1 : i64, tpu.core_type = #tpu.core_type<tc>, window_params = [{pipeline_mode = #tpu.pipeline_mode<synchronous>, transform_indices = @transform_0, window_bounds = array<i64: 1, 8, 32>}, {pipeline_mode = #tpu.pipeline_mode<synchronous>, transform_indices = @transform_1, window_bounds = array<i64: 6, 32>}, {pipeline_mode = #tpu.pipeline_mode<synchronous>, transform_indices = @transform_2, window_bounds = array<i64: 1, 128>}, {pipeline_mode = #tpu.pipeline_mode<synchronous>, transform_indices = @transform_3, window_bounds = array<i64: 32, 32>}, {pipeline_mode = #tpu.pipeline_mode<synchronous>, transform_indices = @transform_4, window_bounds = array<i64: 32, 64>}, {pipeline_mode = #tpu.pipeline_mode<synchronous>, transform_indices = @transform_5, window_bounds = array<i64: 32, 32>}, {pipeline_mode = #tpu.pipeline_mode<synchronous>, transform_indices = @transform_6, window_bounds = array<i64: 32, 128>}, {pipeline_mode = #tpu.pipeline_mode<synchronous>, transform_indices = @transform_7, window_bounds = array<i64: 128, 32>}, {transform_indices = @transform_8, window_bounds = array<i64: 1, 8, 32>}]} {
    %c0 = arith.constant 0 : index
    %c0_0 = arith.constant 0 : index
    %0 = vector.load %arg3[%c0, %c0_0] : memref<6x32xf32, #tpu.memory_space<vmem>>, vector<6x32xf32>
    %1 = vector.extract_strided_slice %0 {offsets = [0, 0], sizes = [1, 32], strides = [1, 1]} : vector<6x32xf32> to vector<1x32xf32>
    %2 = vector.extract_strided_slice %0 {offsets = [1, 0], sizes = [1, 32], strides = [1, 1]} : vector<6x32xf32> to vector<1x32xf32>
    %3 = vector.extract_strided_slice %0 {offsets = [2, 0], sizes = [1, 32], strides = [1, 1]} : vector<6x32xf32> to vector<1x32xf32>
    %4 = vector.extract_strided_slice %0 {offsets = [3, 0], sizes = [1, 32], strides = [1, 1]} : vector<6x32xf32> to vector<1x32xf32>
    %5 = vector.extract_strided_slice %0 {offsets = [4, 0], sizes = [1, 32], strides = [1, 1]} : vector<6x32xf32> to vector<1x32xf32>
    %6 = vector.extract_strided_slice %0 {offsets = [5, 0], sizes = [1, 32], strides = [1, 1]} : vector<6x32xf32> to vector<1x32xf32>
    %c0_i32 = arith.constant 0 : i32
    %7 = arith.cmpi eq, %arg1, %c0_i32 : i32
    %8 = arith.extui %7 : i1 to i32
    %c0_i32_1 = arith.constant 0 : i32
    %9 = arith.cmpi ne, %8, %c0_i32_1 : i32
    scf.if %9 {
      %c0_41 = arith.constant 0 : index
      %c0_42 = arith.constant 0 : index
      %c0_43 = arith.constant 0 : index
      %110 = vector.load %arg2[%c0_41, %c0_42, %c0_43] : memref<1x8x32xf32, #tpu.memory_space<vmem>>, vector<1x8x32xf32>
      %111 = vector.shape_cast %110 : vector<1x8x32xf32> to vector<8x32xf32>
      %cst_44 = arith.constant dense<0.000000e+00> : vector<8xf32>
      %112 = vector.multi_reduction <add>, %111, %cst_44 [1] : vector<8x32xf32> to vector<8xf32>
      %113 = vector.shape_cast %112 : vector<8xf32> to vector<8x1xf32>
      %cst_45 = arith.constant 3.200000e+01 : f32
      %114 = vector.broadcast %cst_45 : f32 to vector<8x1xf32>
      %115 = arith.divf %113, %114 : vector<8x1xf32>
      %116 = vector.broadcast %115 : vector<8x1xf32> to vector<8x32xf32>
      %117 = arith.subf %111, %116 : vector<8x32xf32>
      %118 = arith.mulf %117, %117 : vector<8x32xf32>
      %cst_46 = arith.constant dense<0.000000e+00> : vector<8xf32>
      %119 = vector.multi_reduction <add>, %118, %cst_46 [1] : vector<8x32xf32> to vector<8xf32>
      %120 = vector.shape_cast %119 : vector<8xf32> to vector<8x1xf32>
      %cst_47 = arith.constant 3.200000e+01 : f32
      %121 = vector.broadcast %cst_47 : f32 to vector<8x1xf32>
      %122 = arith.divf %120, %121 : vector<8x1xf32>
      %123 = vector.broadcast %115 : vector<8x1xf32> to vector<8x32xf32>
      %124 = arith.subf %111, %123 : vector<8x32xf32>
      %cst_48 = arith.constant 9.99999974E-6 : f32
      %125 = vector.broadcast %cst_48 : f32 to vector<8x1xf32>
      %126 = arith.addf %122, %125 : vector<8x1xf32>
      %127 = math.rsqrt %126 : vector<8x1xf32>
      %128 = vector.broadcast %127 : vector<8x1xf32> to vector<8x32xf32>
      %129 = arith.mulf %124, %128 : vector<8x32xf32>
      %130 = vector.broadcast %1 : vector<1x32xf32> to vector<8x32xf32>
      %131 = arith.mulf %129, %130 : vector<8x32xf32>
      %132 = vector.broadcast %2 : vector<1x32xf32> to vector<8x32xf32>
      %133 = arith.addf %131, %132 : vector<8x32xf32>
      %134 = arith.truncf %133 : vector<8x32xf32> to vector<8x32xbf16>
      %c0_49 = arith.constant 0 : index
      %c0_50 = arith.constant 0 : index
      %135 = vector.load %arg6[%c0_49, %c0_50] : memref<32x64xbf16, #tpu.memory_space<vmem>>, vector<32x32xbf16>
      %cst_51 = arith.constant dense<0.000000e+00> : vector<8x32xf32>
      %136 = tpu.matmul %134, %135, %cst_51 {dimension_numbers = #tpu.dot_dimension_numbers<[1], [0], [0], [1], [0, 0, 1, 1], [], []>} : vector<8x32xbf16>, vector<32x32xbf16>, vector<8x32xf32> -> vector<8x32xf32>
      %137 = arith.truncf %136 : vector<8x32xf32> to vector<8x32xbf16>
      %c0_52 = arith.constant 0 : index
      %c0_53 = arith.constant 0 : index
      %c0_54 = arith.constant 0 : index
      %138 = vector.load %arg11[%c0_52, %c0_53, %c0_54] : memref<2x8x32xbf16, #tpu.memory_space<vmem>>, vector<1x8x32xbf16>
      %139 = vector.shape_cast %138 : vector<1x8x32xbf16> to vector<8x32xbf16>
      %140 = vector.shape_cast %137 : vector<8x32xbf16> to vector<1x8x32xbf16>
      tpu.vector_store %arg11[%c0_52, %c0_53, %c0_54], %140 {strides = array<i32>} : memref<2x8x32xbf16, #tpu.memory_space<vmem>>, vector<1x8x32xbf16>,
      %c0_55 = arith.constant 0 : index
      %c32 = arith.constant 32 : index
      %141 = vector.load %arg6[%c0_55, %c32] : memref<32x64xbf16, #tpu.memory_space<vmem>>, vector<32x32xbf16>
      %cst_56 = arith.constant dense<0.000000e+00> : vector<8x32xf32>
      %142 = tpu.matmul %134, %141, %cst_56 {dimension_numbers = #tpu.dot_dimension_numbers<[1], [0], [0], [1], [0, 0, 1, 1], [], []>} : vector<8x32xbf16>, vector<32x32xbf16>, vector<8x32xf32> -> vector<8x32xf32>
      %143 = arith.truncf %142 : vector<8x32xf32> to vector<8x32xbf16>
      %c1_57 = arith.constant 1 : index
      %c0_58 = arith.constant 0 : index
      %c0_59 = arith.constant 0 : index
      %144 = vector.load %arg11[%c1_57, %c0_58, %c0_59] : memref<2x8x32xbf16, #tpu.memory_space<vmem>>, vector<1x8x32xbf16>
      %145 = vector.shape_cast %144 : vector<1x8x32xbf16> to vector<8x32xbf16>
      %146 = vector.shape_cast %143 : vector<8x32xbf16> to vector<1x8x32xbf16>
      tpu.vector_store %arg11[%c1_57, %c0_58, %c0_59], %146 {strides = array<i32>} : memref<2x8x32xbf16, #tpu.memory_space<vmem>>, vector<1x8x32xbf16>,
    } else {
    }
    %c8_i32 = arith.constant 8 : i32
    %10 = arith.muli %arg1, %c8_i32 : i32
    %11 = tpu.assume_multiple %10, 8 : i32
    %c0_2 = arith.constant 0 : index
    %12 = arith.index_cast %11 : i32 to index
    %c0_3 = arith.constant 0 : index
    %13 = vector.load %arg2[%c0_2, %12, %c0_3] : memref<1x8x32xf32, #tpu.memory_space<vmem>>, vector<1x8x32xf32>
    %14 = vector.shape_cast %13 : vector<1x8x32xf32> to vector<8x32xf32>
    %cst = arith.constant dense<0.000000e+00> : vector<8xf32>
    %15 = vector.multi_reduction <add>, %14, %cst [1] : vector<8x32xf32> to vector<8xf32>
    %16 = vector.shape_cast %15 : vector<8xf32> to vector<8x1xf32>
    %cst_4 = arith.constant 3.200000e+01 : f32
    %17 = vector.broadcast %cst_4 : f32 to vector<8x1xf32>
    %18 = arith.divf %16, %17 : vector<8x1xf32>
    %19 = vector.broadcast %18 : vector<8x1xf32> to vector<8x32xf32>
    %20 = arith.subf %14, %19 : vector<8x32xf32>
    %21 = arith.mulf %20, %20 : vector<8x32xf32>
    %cst_5 = arith.constant dense<0.000000e+00> : vector<8xf32>
    %22 = vector.multi_reduction <add>, %21, %cst_5 [1] : vector<8x32xf32> to vector<8xf32>
    %23 = vector.shape_cast %22 : vector<8xf32> to vector<8x1xf32>
    %cst_6 = arith.constant 3.200000e+01 : f32
    %24 = vector.broadcast %cst_6 : f32 to vector<8x1xf32>
    %25 = arith.divf %23, %24 : vector<8x1xf32>
    %26 = vector.broadcast %18 : vector<8x1xf32> to vector<8x32xf32>
    %27 = arith.subf %14, %26 : vector<8x32xf32>
    %cst_7 = arith.constant 9.99999974E-6 : f32
    %28 = vector.broadcast %cst_7 : f32 to vector<8x1xf32>
    %29 = arith.addf %25, %28 : vector<8x1xf32>
    %30 = math.rsqrt %29 : vector<8x1xf32>
    %31 = vector.broadcast %30 : vector<8x1xf32> to vector<8x32xf32>
    %32 = arith.mulf %27, %31 : vector<8x32xf32>
    %33 = vector.broadcast %1 : vector<1x32xf32> to vector<8x32xf32>
    %34 = arith.mulf %32, %33 : vector<8x32xf32>
    %35 = vector.broadcast %2 : vector<1x32xf32> to vector<8x32xf32>
    %36 = arith.addf %34, %35 : vector<8x32xf32>
    %37 = arith.truncf %36 : vector<8x32xf32> to vector<8x32xbf16>
    %c0_8 = arith.constant 0 : index
    %c0_9 = arith.constant 0 : index
    %38 = vector.load %arg5[%c0_8, %c0_9] : memref<32x32xbf16, #tpu.memory_space<vmem>>, vector<32x32xbf16>
    %cst_10 = arith.constant dense<0.000000e+00> : vector<8x32xf32>
    %39 = tpu.matmul %37, %38, %cst_10 {dimension_numbers = #tpu.dot_dimension_numbers<[1], [0], [0], [1], [0, 0, 1, 1], [], []>} : vector<8x32xbf16>, vector<32x32xbf16>, vector<8x32xf32> -> vector<8x32xf32>
    %cst_11 = arith.constant 0.353553385 : f32
    %40 = vector.broadcast %cst_11 : f32 to vector<8x32xf32>
    %41 = arith.mulf %39, %40 : vector<8x32xf32>
    %42 = arith.truncf %41 : vector<8x32xf32> to vector<8x32xbf16>
    %43 = vector.shape_cast %42 : vector<8x32xbf16> to vector<8x4x8xbf16>
    %c0_12 = arith.constant 0 : index
    %c0_13 = arith.constant 0 : index
    %c0_14 = arith.constant 0 : index
    %44 = vector.load %arg11[%c0_12, %c0_13, %c0_14] : memref<2x8x32xbf16, #tpu.memory_space<vmem>>, vector<1x8x32xbf16>
    %45 = vector.shape_cast %44 : vector<1x8x32xbf16> to vector<8x32xbf16>
    %46 = vector.shape_cast %45 : vector<8x32xbf16> to vector<8x4x8xbf16>
    %c1 = arith.constant 1 : index
    %c0_15 = arith.constant 0 : index
    %c0_16 = arith.constant 0 : index
    %47 = vector.load %arg11[%c1, %c0_15, %c0_16] : memref<2x8x32xbf16, #tpu.memory_space<vmem>>, vector<1x8x32xbf16>
    %48 = vector.shape_cast %47 : vector<1x8x32xbf16> to vector<8x32xbf16>
    %49 = vector.shape_cast %48 : vector<8x32xbf16> to vector<8x4x8xbf16>
    %cst_17 = arith.constant dense<0.000000e+00> : vector<4x8x8xf32>
    %50 = tpu.matmul %43, %46, %cst_17 {dimension_numbers = #tpu.dot_dimension_numbers<[2], [2], [0], [0], [0, 1, 0, 0, 1, 0], [1], [1]>} : vector<8x4x8xbf16>, vector<8x4x8xbf16>, vector<4x8x8xf32> -> vector<4x8x8xf32>
    %cst_18 = arith.constant dense<0xFF800000> : vector<4x8xf32>
    %51 = vector.multi_reduction <maximumf>, %50, %cst_18 [2] : vector<4x8x8xf32> to vector<4x8xf32>
    %52 = vector.shape_cast %51 : vector<4x8xf32> to vector<4x8x1xf32>
    %53 = vector.broadcast %52 : vector<4x8x1xf32> to vector<4x8x8xf32>
    %54 = arith.subf %50, %53 : vector<4x8x8xf32>
    %55 = math.exp %54 : vector<4x8x8xf32>
    %cst_19 = arith.constant dense<0.000000e+00> : vector<4x8xf32>
    %56 = vector.multi_reduction <add>, %55, %cst_19 [2] : vector<4x8x8xf32> to vector<4x8xf32>
    %57 = vector.shape_cast %56 : vector<4x8xf32> to vector<4x8x1xf32>
    %58 = arith.truncf %55 : vector<4x8x8xf32> to vector<4x8x8xbf16>
    %cst_20 = arith.constant dense<0.000000e+00> : vector<4x8x8xf32>
    %59 = tpu.matmul %58, %49, %cst_20 {dimension_numbers = #tpu.dot_dimension_numbers<[2], [0], [1], [2], [0, 0, 0, 1, 1, 2], [0], [1]>} : vector<4x8x8xbf16>, vector<8x4x8xbf16>, vector<4x8x8xf32> -> vector<4x8x8xf32>
    %60 = tpu.reciprocal %57 {approx = true} : vector<4x8x1xf32> -> vector<4x8x1xf32>
    %61 = vector.broadcast %60 : vector<4x8x1xf32> to vector<4x8x8xf32>
    %62 = arith.mulf %59, %61 : vector<4x8x8xf32>
    %63 = tpu.transpose %62, [1, 0, 2] : vector<4x8x8xf32> -> vector<8x4x8xf32>
    %64 = vector.shape_cast %63 : vector<8x4x8xf32> to vector<8x32xf32>
    %65 = arith.truncf %64 : vector<8x32xf32> to vector<8x32xbf16>
    %c0_21 = arith.constant 0 : index
    %c0_22 = arith.constant 0 : index
    %66 = vector.load %arg7[%c0_21, %c0_22] : memref<32x32xbf16, #tpu.memory_space<vmem>>, vector<32x32xbf16>
    %cst_23 = arith.constant dense<0.000000e+00> : vector<8x32xf32>
    %67 = tpu.matmul %65, %66, %cst_23 {dimension_numbers = #tpu.dot_dimension_numbers<[1], [0], [0], [1], [0, 0, 1, 1], [], []>} : vector<8x32xbf16>, vector<32x32xbf16>, vector<8x32xf32> -> vector<8x32xf32>
    %68 = vector.broadcast %3 : vector<1x32xf32> to vector<8x32xf32>
    %69 = arith.addf %67, %68 : vector<8x32xf32>
    %70 = arith.addf %14, %69 : vector<8x32xf32>
    %cst_24 = arith.constant dense<0.000000e+00> : vector<8xf32>
    %71 = vector.multi_reduction <add>, %70, %cst_24 [1] : vector<8x32xf32> to vector<8xf32>
    %72 = vector.shape_cast %71 : vector<8xf32> to vector<8x1xf32>
    %cst_25 = arith.constant 3.200000e+01 : f32
    %73 = vector.broadcast %cst_25 : f32 to vector<8x1xf32>
    %74 = arith.divf %72, %73 : vector<8x1xf32>
    %75 = vector.broadcast %74 : vector<8x1xf32> to vector<8x32xf32>
    %76 = arith.subf %70, %75 : vector<8x32xf32>
    %77 = arith.mulf %76, %76 : vector<8x32xf32>
    %cst_26 = arith.constant dense<0.000000e+00> : vector<8xf32>
    %78 = vector.multi_reduction <add>, %77, %cst_26 [1] : vector<8x32xf32> to vector<8xf32>
    %79 = vector.shape_cast %78 : vector<8xf32> to vector<8x1xf32>
    %cst_27 = arith.constant 3.200000e+01 : f32
    %80 = vector.broadcast %cst_27 : f32 to vector<8x1xf32>
    %81 = arith.divf %79, %80 : vector<8x1xf32>
    %82 = vector.broadcast %74 : vector<8x1xf32> to vector<8x32xf32>
    %83 = arith.subf %70, %82 : vector<8x32xf32>
    %cst_28 = arith.constant 9.99999974E-6 : f32
    %84 = vector.broadcast %cst_28 : f32 to vector<8x1xf32>
    %85 = arith.addf %81, %84 : vector<8x1xf32>
    %86 = math.rsqrt %85 : vector<8x1xf32>
    %87 = vector.broadcast %86 : vector<8x1xf32> to vector<8x32xf32>
    %88 = arith.mulf %83, %87 : vector<8x32xf32>
    %89 = vector.broadcast %4 : vector<1x32xf32> to vector<8x32xf32>
    %90 = arith.mulf %88, %89 : vector<8x32xf32>
    %91 = vector.broadcast %5 : vector<1x32xf32> to vector<8x32xf32>
    %92 = arith.addf %90, %91 : vector<8x32xf32>
    %93 = arith.truncf %92 : vector<8x32xf32> to vector<8x32xbf16>
    %c0_29 = arith.constant 0 : index
    %c0_30 = arith.constant 0 : index
    %94 = vector.load %arg8[%c0_29, %c0_30] : memref<32x128xbf16, #tpu.memory_space<vmem>>, vector<32x128xbf16>
    %cst_31 = arith.constant dense<0.000000e+00> : vector<8x128xf32>
    %95 = tpu.matmul %93, %94, %cst_31 {dimension_numbers = #tpu.dot_dimension_numbers<[1], [0], [0], [1], [0, 0, 1, 1], [], []>} : vector<8x32xbf16>, vector<32x128xbf16>, vector<8x128xf32> -> vector<8x128xf32>
    %c0_32 = arith.constant 0 : index
    %c0_33 = arith.constant 0 : index
    %96 = vector.load %arg4[%c0_32, %c0_33] : memref<1x128xf32, #tpu.memory_space<vmem>>, vector<1x128xf32>
    %97 = vector.broadcast %96 : vector<1x128xf32> to vector<8x128xf32>
    %98 = arith.addf %95, %97 : vector<8x128xf32>
    %cst_34 = arith.constant 0.000000e+00 : f32
    %99 = vector.broadcast %cst_34 : f32 to vector<8x128xf32>
    %100 = arith.maximumf %98, %99 : vector<8x128xf32>
    %101 = arith.truncf %100 : vector<8x128xf32> to vector<8x128xbf16>
    %c0_35 = arith.constant 0 : index
    %c0_36 = arith.constant 0 : index
    %102 = vector.load %arg9[%c0_35, %c0_36] : memref<128x32xbf16, #tpu.memory_space<vmem>>, vector<128x32xbf16>
    %cst_37 = arith.constant dense<0.000000e+00> : vector<8x32xf32>
    %103 = tpu.matmul %101, %102, %cst_37 {dimension_numbers = #tpu.dot_dimension_numbers<[1], [0], [0], [1], [0, 0, 1, 1], [], []>} : vector<8x128xbf16>, vector<128x32xbf16>, vector<8x32xf32> -> vector<8x32xf32>
    %104 = vector.broadcast %6 : vector<1x32xf32> to vector<8x32xf32>
    %105 = arith.addf %103, %104 : vector<8x32xf32>
    %106 = arith.addf %70, %105 : vector<8x32xf32>
    %c0_38 = arith.constant 0 : index
    %c0_39 = arith.constant 0 : index
    %c0_40 = arith.constant 0 : index
    %107 = vector.load %arg10[%c0_38, %c0_39, %c0_40] : memref<1x8x32xf32, #tpu.memory_space<vmem>>, vector<1x8x32xf32>
    %108 = vector.shape_cast %107 : vector<1x8x32xf32> to vector<8x32xf32>
    %109 = vector.shape_cast %106 : vector<8x32xf32> to vector<1x8x32xf32>
    tpu.vector_store %arg10[%c0_38, %c0_39, %c0_40], %109 {strides = array<i32>} : memref<1x8x32xf32, #tpu.memory_space<vmem>>, vector<1x8x32xf32>,
    return
  }
  func.func @transform_0(%arg0: i32, %arg1: i32) -> (i32, i32, i32) {
    %c0_i32 = arith.constant 0 : i32
    %c0_i32_0 = arith.constant 0 : i32
    %c0_i32_1 = arith.constant 0 : i32
    return %arg0, %c0_i32, %c0_i32_0 : i32, i32, i32
  }
  func.func @transform_1(%arg0: i32, %arg1: i32) -> (i32, i32) {
    %c0_i32 = arith.constant 0 : i32
    %c0_i32_0 = arith.constant 0 : i32
    %c0_i32_1 = arith.constant 0 : i32
    return %c0_i32, %c0_i32_0 : i32, i32
  }
  func.func @transform_2(%arg0: i32, %arg1: i32) -> (i32, i32) {
    %c0_i32 = arith.constant 0 : i32
    %c0_i32_0 = arith.constant 0 : i32
    %c0_i32_1 = arith.constant 0 : i32
    return %c0_i32, %c0_i32_0 : i32, i32
  }
  func.func @transform_3(%arg0: i32, %arg1: i32) -> (i32, i32) {
    %c0_i32 = arith.constant 0 : i32
    %c0_i32_0 = arith.constant 0 : i32
    %c0_i32_1 = arith.constant 0 : i32
    return %c0_i32, %c0_i32_0 : i32, i32
  }
  func.func @transform_4(%arg0: i32, %arg1: i32) -> (i32, i32) {
    %c0_i32 = arith.constant 0 : i32
    %c0_i32_0 = arith.constant 0 : i32
    %c0_i32_1 = arith.constant 0 : i32
    return %c0_i32, %c0_i32_0 : i32, i32
  }
  func.func @transform_5(%arg0: i32, %arg1: i32) -> (i32, i32) {
    %c0_i32 = arith.constant 0 : i32
    %c0_i32_0 = arith.constant 0 : i32
    %c0_i32_1 = arith.constant 0 : i32
    return %c0_i32, %c0_i32_0 : i32, i32
  }
  func.func @transform_6(%arg0: i32, %arg1: i32) -> (i32, i32) {
    %c0_i32 = arith.constant 0 : i32
    %c0_i32_0 = arith.constant 0 : i32
    %c0_i32_1 = arith.constant 0 : i32
    return %c0_i32, %c0_i32_0 : i32, i32
  }
  func.func @transform_7(%arg0: i32, %arg1: i32) -> (i32, i32) {
    %c0_i32 = arith.constant 0 : i32
    %c0_i32_0 = arith.constant 0 : i32
    %c0_i32_1 = arith.constant 0 : i32
    return %c0_i32, %c0_i32_0 : i32, i32
  }
  func.func @transform_8(%arg0: i32, %arg1: i32) -> (i32, i32, i32) {
    %c0_i32 = arith.constant 0 : i32
    %c0_i32_0 = arith.constant 0 : i32
    return %arg0, %arg1, %c0_i32 : i32, i32, i32
  }
}

module attributes {stable_mosaic.version = 11 : i64} {
  func.func @_transformer_layer_kernel(%arg0: i32, %arg1: i32, %arg2: memref<1x8x32xf32, #tpu.memory_space<vmem>>, %arg3: memref<6x32xf32, #tpu.memory_space<vmem>>, %arg4: memref<1x128xf32, #tpu.memory_space<vmem>>, %arg5: memref<32x32xbf16, #tpu.memory_space<vmem>>, %arg6: memref<32x64xbf16, #tpu.memory_space<vmem>>, %arg7: memref<32x32xbf16, #tpu.memory_space<vmem>>, %arg8: memref<32x128xbf16, #tpu.memory_space<vmem>>, %arg9: memref<128x32xbf16, #tpu.memory_space<vmem>>, %arg10: memref<1x8x32xf32, #tpu.memory_space<vmem>>, %arg11: memref<2x8x32xbf16, #tpu.memory_space<vmem>>) attributes {dimension_semantics = [#tpu.dimension_semantics<parallel>, #tpu.dimension_semantics<arbitrary>], iteration_bounds = array<i64: 2, 1>, scalar_prefetch = 0 : i64, scratch_operands = 1 : i64, tpu.core_type = #tpu.core_type<tc>, window_params = [{transform_indices = @transform_0, window_bounds = array<i64: 1, 8, 32>}, {pipeline_mode = #tpu.pipeline_mode<synchronous>, transform_indices = @transform_1, window_bounds = array<i64: 6, 32>}, {pipeline_mode = #tpu.pipeline_mode<synchronous>, transform_indices = @transform_2, window_bounds = array<i64: 1, 128>}, {pipeline_mode = #tpu.pipeline_mode<synchronous>, transform_indices = @transform_3, window_bounds = array<i64: 32, 32>}, {pipeline_mode = #tpu.pipeline_mode<synchronous>, transform_indices = @transform_4, window_bounds = array<i64: 32, 64>}, {pipeline_mode = #tpu.pipeline_mode<synchronous>, transform_indices = @transform_5, window_bounds = array<i64: 32, 32>}, {pipeline_mode = #tpu.pipeline_mode<synchronous>, transform_indices = @transform_6, window_bounds = array<i64: 32, 128>}, {pipeline_mode = #tpu.pipeline_mode<synchronous>, transform_indices = @transform_7, window_bounds = array<i64: 128, 32>}, {transform_indices = @transform_8, window_bounds = array<i64: 1, 8, 32>}]} {
    %c0 = arith.constant 0 : index
    %c0_0 = arith.constant 0 : index
    %0 = vector.load %arg3[%c0, %c0_0] : memref<6x32xf32, #tpu.memory_space<vmem>>, vector<6x32xf32>
    %1 = vector.extract_strided_slice %0 {offsets = [0, 0], sizes = [1, 32], strides = [1, 1]} : vector<6x32xf32> to vector<1x32xf32>
    %2 = vector.extract_strided_slice %0 {offsets = [1, 0], sizes = [1, 32], strides = [1, 1]} : vector<6x32xf32> to vector<1x32xf32>
    %3 = vector.extract_strided_slice %0 {offsets = [2, 0], sizes = [1, 32], strides = [1, 1]} : vector<6x32xf32> to vector<1x32xf32>
    %4 = vector.extract_strided_slice %0 {offsets = [3, 0], sizes = [1, 32], strides = [1, 1]} : vector<6x32xf32> to vector<1x32xf32>
    %5 = vector.extract_strided_slice %0 {offsets = [4, 0], sizes = [1, 32], strides = [1, 1]} : vector<6x32xf32> to vector<1x32xf32>
    %6 = vector.extract_strided_slice %0 {offsets = [5, 0], sizes = [1, 32], strides = [1, 1]} : vector<6x32xf32> to vector<1x32xf32>
    %c0_i32 = arith.constant 0 : i32
    %7 = arith.cmpi eq, %arg1, %c0_i32 : i32
    %8 = arith.extui %7 : i1 to i32
    %c0_i32_1 = arith.constant 0 : i32
    %9 = arith.cmpi ne, %8, %c0_i32_1 : i32
    scf.if %9 {
      %c0_41 = arith.constant 0 : index
      %c0_42 = arith.constant 0 : index
      %c0_43 = arith.constant 0 : index
      %110 = vector.load %arg2[%c0_41, %c0_42, %c0_43] : memref<1x8x32xf32, #tpu.memory_space<vmem>>, vector<1x8x32xf32>
      %111 = vector.shape_cast %110 : vector<1x8x32xf32> to vector<8x32xf32>
      %cst_44 = arith.constant dense<0.000000e+00> : vector<8xf32>
      %112 = vector.multi_reduction <add>, %111, %cst_44 [1] : vector<8x32xf32> to vector<8xf32>
      %113 = vector.shape_cast %112 : vector<8xf32> to vector<8x1xf32>
      %cst_45 = arith.constant 3.200000e+01 : f32
      %114 = vector.broadcast %cst_45 : f32 to vector<8x1xf32>
      %115 = arith.divf %113, %114 : vector<8x1xf32>
      %116 = vector.broadcast %115 : vector<8x1xf32> to vector<8x32xf32>
      %117 = arith.subf %111, %116 : vector<8x32xf32>
      %118 = arith.mulf %117, %117 : vector<8x32xf32>
      %cst_46 = arith.constant dense<0.000000e+00> : vector<8xf32>
      %119 = vector.multi_reduction <add>, %118, %cst_46 [1] : vector<8x32xf32> to vector<8xf32>
      %120 = vector.shape_cast %119 : vector<8xf32> to vector<8x1xf32>
      %cst_47 = arith.constant 3.200000e+01 : f32
      %121 = vector.broadcast %cst_47 : f32 to vector<8x1xf32>
      %122 = arith.divf %120, %121 : vector<8x1xf32>
      %123 = vector.broadcast %115 : vector<8x1xf32> to vector<8x32xf32>
      %124 = arith.subf %111, %123 : vector<8x32xf32>
      %cst_48 = arith.constant 9.99999974E-6 : f32
      %125 = vector.broadcast %cst_48 : f32 to vector<8x1xf32>
      %126 = arith.addf %122, %125 : vector<8x1xf32>
      %127 = math.rsqrt %126 : vector<8x1xf32>
      %128 = vector.broadcast %127 : vector<8x1xf32> to vector<8x32xf32>
      %129 = arith.mulf %124, %128 : vector<8x32xf32>
      %130 = vector.broadcast %1 : vector<1x32xf32> to vector<8x32xf32>
      %131 = arith.mulf %129, %130 : vector<8x32xf32>
      %132 = vector.broadcast %2 : vector<1x32xf32> to vector<8x32xf32>
      %133 = arith.addf %131, %132 : vector<8x32xf32>
      %134 = arith.truncf %133 : vector<8x32xf32> to vector<8x32xbf16>
      %c0_49 = arith.constant 0 : index
      %c0_50 = arith.constant 0 : index
      %135 = vector.load %arg6[%c0_49, %c0_50] : memref<32x64xbf16, #tpu.memory_space<vmem>>, vector<32x32xbf16>
      %cst_51 = arith.constant dense<0.000000e+00> : vector<8x32xf32>
      %136 = tpu.matmul %134, %135, %cst_51 {dimension_numbers = #tpu.dot_dimension_numbers<[1], [0], [0], [1], [0, 0, 1, 1], [], []>} : vector<8x32xbf16>, vector<32x32xbf16>, vector<8x32xf32> -> vector<8x32xf32>
      %137 = arith.truncf %136 : vector<8x32xf32> to vector<8x32xbf16>
      %c0_52 = arith.constant 0 : index
      %c0_53 = arith.constant 0 : index
      %c0_54 = arith.constant 0 : index
      %138 = vector.load %arg11[%c0_52, %c0_53, %c0_54] : memref<2x8x32xbf16, #tpu.memory_space<vmem>>, vector<1x8x32xbf16>
      %139 = vector.shape_cast %138 : vector<1x8x32xbf16> to vector<8x32xbf16>
      %140 = vector.shape_cast %137 : vector<8x32xbf16> to vector<1x8x32xbf16>
      tpu.vector_store %arg11[%c0_52, %c0_53, %c0_54], %140 {strides = array<i32>} : memref<2x8x32xbf16, #tpu.memory_space<vmem>>, vector<1x8x32xbf16>,
      %c0_55 = arith.constant 0 : index
      %c32 = arith.constant 32 : index
      %141 = vector.load %arg6[%c0_55, %c32] : memref<32x64xbf16, #tpu.memory_space<vmem>>, vector<32x32xbf16>
      %cst_56 = arith.constant dense<0.000000e+00> : vector<8x32xf32>
      %142 = tpu.matmul %134, %141, %cst_56 {dimension_numbers = #tpu.dot_dimension_numbers<[1], [0], [0], [1], [0, 0, 1, 1], [], []>} : vector<8x32xbf16>, vector<32x32xbf16>, vector<8x32xf32> -> vector<8x32xf32>
      %143 = arith.truncf %142 : vector<8x32xf32> to vector<8x32xbf16>
      %c1_57 = arith.constant 1 : index
      %c0_58 = arith.constant 0 : index
      %c0_59 = arith.constant 0 : index
      %144 = vector.load %arg11[%c1_57, %c0_58, %c0_59] : memref<2x8x32xbf16, #tpu.memory_space<vmem>>, vector<1x8x32xbf16>
      %145 = vector.shape_cast %144 : vector<1x8x32xbf16> to vector<8x32xbf16>
      %146 = vector.shape_cast %143 : vector<8x32xbf16> to vector<1x8x32xbf16>
      tpu.vector_store %arg11[%c1_57, %c0_58, %c0_59], %146 {strides = array<i32>} : memref<2x8x32xbf16, #tpu.memory_space<vmem>>, vector<1x8x32xbf16>,
    } else {
    }
    %c8_i32 = arith.constant 8 : i32
    %10 = arith.muli %arg1, %c8_i32 : i32
    %11 = tpu.assume_multiple %10, 8 : i32
    %c0_2 = arith.constant 0 : index
    %12 = arith.index_cast %11 : i32 to index
    %c0_3 = arith.constant 0 : index
    %13 = vector.load %arg2[%c0_2, %12, %c0_3] : memref<1x8x32xf32, #tpu.memory_space<vmem>>, vector<1x8x32xf32>
    %14 = vector.shape_cast %13 : vector<1x8x32xf32> to vector<8x32xf32>
    %cst = arith.constant dense<0.000000e+00> : vector<8xf32>
    %15 = vector.multi_reduction <add>, %14, %cst [1] : vector<8x32xf32> to vector<8xf32>
    %16 = vector.shape_cast %15 : vector<8xf32> to vector<8x1xf32>
    %cst_4 = arith.constant 3.200000e+01 : f32
    %17 = vector.broadcast %cst_4 : f32 to vector<8x1xf32>
    %18 = arith.divf %16, %17 : vector<8x1xf32>
    %19 = vector.broadcast %18 : vector<8x1xf32> to vector<8x32xf32>
    %20 = arith.subf %14, %19 : vector<8x32xf32>
    %21 = arith.mulf %20, %20 : vector<8x32xf32>
    %cst_5 = arith.constant dense<0.000000e+00> : vector<8xf32>
    %22 = vector.multi_reduction <add>, %21, %cst_5 [1] : vector<8x32xf32> to vector<8xf32>
    %23 = vector.shape_cast %22 : vector<8xf32> to vector<8x1xf32>
    %cst_6 = arith.constant 3.200000e+01 : f32
    %24 = vector.broadcast %cst_6 : f32 to vector<8x1xf32>
    %25 = arith.divf %23, %24 : vector<8x1xf32>
    %26 = vector.broadcast %18 : vector<8x1xf32> to vector<8x32xf32>
    %27 = arith.subf %14, %26 : vector<8x32xf32>
    %cst_7 = arith.constant 9.99999974E-6 : f32
    %28 = vector.broadcast %cst_7 : f32 to vector<8x1xf32>
    %29 = arith.addf %25, %28 : vector<8x1xf32>
    %30 = math.rsqrt %29 : vector<8x1xf32>
    %31 = vector.broadcast %30 : vector<8x1xf32> to vector<8x32xf32>
    %32 = arith.mulf %27, %31 : vector<8x32xf32>
    %33 = vector.broadcast %1 : vector<1x32xf32> to vector<8x32xf32>
    %34 = arith.mulf %32, %33 : vector<8x32xf32>
    %35 = vector.broadcast %2 : vector<1x32xf32> to vector<8x32xf32>
    %36 = arith.addf %34, %35 : vector<8x32xf32>
    %37 = arith.truncf %36 : vector<8x32xf32> to vector<8x32xbf16>
    %c0_8 = arith.constant 0 : index
    %c0_9 = arith.constant 0 : index
    %38 = vector.load %arg5[%c0_8, %c0_9] : memref<32x32xbf16, #tpu.memory_space<vmem>>, vector<32x32xbf16>
    %cst_10 = arith.constant dense<0.000000e+00> : vector<8x32xf32>
    %39 = tpu.matmul %37, %38, %cst_10 {dimension_numbers = #tpu.dot_dimension_numbers<[1], [0], [0], [1], [0, 0, 1, 1], [], []>} : vector<8x32xbf16>, vector<32x32xbf16>, vector<8x32xf32> -> vector<8x32xf32>
    %cst_11 = arith.constant 0.353553385 : f32
    %40 = vector.broadcast %cst_11 : f32 to vector<8x32xf32>
    %41 = arith.mulf %39, %40 : vector<8x32xf32>
    %42 = arith.truncf %41 : vector<8x32xf32> to vector<8x32xbf16>
    %43 = vector.shape_cast %42 : vector<8x32xbf16> to vector<8x4x8xbf16>
    %c0_12 = arith.constant 0 : index
    %c0_13 = arith.constant 0 : index
    %c0_14 = arith.constant 0 : index
    %44 = vector.load %arg11[%c0_12, %c0_13, %c0_14] : memref<2x8x32xbf16, #tpu.memory_space<vmem>>, vector<1x8x32xbf16>
    %45 = vector.shape_cast %44 : vector<1x8x32xbf16> to vector<8x32xbf16>
    %46 = vector.shape_cast %45 : vector<8x32xbf16> to vector<8x4x8xbf16>
    %c1 = arith.constant 1 : index
    %c0_15 = arith.constant 0 : index
    %c0_16 = arith.constant 0 : index
    %47 = vector.load %arg11[%c1, %c0_15, %c0_16] : memref<2x8x32xbf16, #tpu.memory_space<vmem>>, vector<1x8x32xbf16>
    %48 = vector.shape_cast %47 : vector<1x8x32xbf16> to vector<8x32xbf16>
    %49 = vector.shape_cast %48 : vector<8x32xbf16> to vector<8x4x8xbf16>
    %cst_17 = arith.constant dense<0.000000e+00> : vector<4x8x8xf32>
    %50 = tpu.matmul %43, %46, %cst_17 {dimension_numbers = #tpu.dot_dimension_numbers<[2], [2], [0], [0], [0, 1, 0, 0, 1, 0], [1], [1]>} : vector<8x4x8xbf16>, vector<8x4x8xbf16>, vector<4x8x8xf32> -> vector<4x8x8xf32>
    %cst_18 = arith.constant dense<0xFF800000> : vector<4x8xf32>
    %51 = vector.multi_reduction <maximumf>, %50, %cst_18 [2] : vector<4x8x8xf32> to vector<4x8xf32>
    %52 = vector.shape_cast %51 : vector<4x8xf32> to vector<4x8x1xf32>
    %53 = vector.broadcast %52 : vector<4x8x1xf32> to vector<4x8x8xf32>
    %54 = arith.subf %50, %53 : vector<4x8x8xf32>
    %55 = math.exp %54 : vector<4x8x8xf32>
    %cst_19 = arith.constant dense<0.000000e+00> : vector<4x8xf32>
    %56 = vector.multi_reduction <add>, %55, %cst_19 [2] : vector<4x8x8xf32> to vector<4x8xf32>
    %57 = vector.shape_cast %56 : vector<4x8xf32> to vector<4x8x1xf32>
    %58 = arith.truncf %55 : vector<4x8x8xf32> to vector<4x8x8xbf16>
    %cst_20 = arith.constant dense<0.000000e+00> : vector<4x8x8xf32>
    %59 = tpu.matmul %58, %49, %cst_20 {dimension_numbers = #tpu.dot_dimension_numbers<[2], [0], [1], [2], [0, 0, 0, 1, 1, 2], [0], [1]>} : vector<4x8x8xbf16>, vector<8x4x8xbf16>, vector<4x8x8xf32> -> vector<4x8x8xf32>
    %60 = tpu.reciprocal %57 {approx = true} : vector<4x8x1xf32> -> vector<4x8x1xf32>
    %61 = vector.broadcast %60 : vector<4x8x1xf32> to vector<4x8x8xf32>
    %62 = arith.mulf %59, %61 : vector<4x8x8xf32>
    %63 = tpu.transpose %62, [1, 0, 2] : vector<4x8x8xf32> -> vector<8x4x8xf32>
    %64 = vector.shape_cast %63 : vector<8x4x8xf32> to vector<8x32xf32>
    %65 = arith.truncf %64 : vector<8x32xf32> to vector<8x32xbf16>
    %c0_21 = arith.constant 0 : index
    %c0_22 = arith.constant 0 : index
    %66 = vector.load %arg7[%c0_21, %c0_22] : memref<32x32xbf16, #tpu.memory_space<vmem>>, vector<32x32xbf16>
    %cst_23 = arith.constant dense<0.000000e+00> : vector<8x32xf32>
    %67 = tpu.matmul %65, %66, %cst_23 {dimension_numbers = #tpu.dot_dimension_numbers<[1], [0], [0], [1], [0, 0, 1, 1], [], []>} : vector<8x32xbf16>, vector<32x32xbf16>, vector<8x32xf32> -> vector<8x32xf32>
    %68 = vector.broadcast %3 : vector<1x32xf32> to vector<8x32xf32>
    %69 = arith.addf %67, %68 : vector<8x32xf32>
    %70 = arith.addf %14, %69 : vector<8x32xf32>
    %cst_24 = arith.constant dense<0.000000e+00> : vector<8xf32>
    %71 = vector.multi_reduction <add>, %70, %cst_24 [1] : vector<8x32xf32> to vector<8xf32>
    %72 = vector.shape_cast %71 : vector<8xf32> to vector<8x1xf32>
    %cst_25 = arith.constant 3.200000e+01 : f32
    %73 = vector.broadcast %cst_25 : f32 to vector<8x1xf32>
    %74 = arith.divf %72, %73 : vector<8x1xf32>
    %75 = vector.broadcast %74 : vector<8x1xf32> to vector<8x32xf32>
    %76 = arith.subf %70, %75 : vector<8x32xf32>
    %77 = arith.mulf %76, %76 : vector<8x32xf32>
    %cst_26 = arith.constant dense<0.000000e+00> : vector<8xf32>
    %78 = vector.multi_reduction <add>, %77, %cst_26 [1] : vector<8x32xf32> to vector<8xf32>
    %79 = vector.shape_cast %78 : vector<8xf32> to vector<8x1xf32>
    %cst_27 = arith.constant 3.200000e+01 : f32
    %80 = vector.broadcast %cst_27 : f32 to vector<8x1xf32>
    %81 = arith.divf %79, %80 : vector<8x1xf32>
    %82 = vector.broadcast %74 : vector<8x1xf32> to vector<8x32xf32>
    %83 = arith.subf %70, %82 : vector<8x32xf32>
    %cst_28 = arith.constant 9.99999974E-6 : f32
    %84 = vector.broadcast %cst_28 : f32 to vector<8x1xf32>
    %85 = arith.addf %81, %84 : vector<8x1xf32>
    %86 = math.rsqrt %85 : vector<8x1xf32>
    %87 = vector.broadcast %86 : vector<8x1xf32> to vector<8x32xf32>
    %88 = arith.mulf %83, %87 : vector<8x32xf32>
    %89 = vector.broadcast %4 : vector<1x32xf32> to vector<8x32xf32>
    %90 = arith.mulf %88, %89 : vector<8x32xf32>
    %91 = vector.broadcast %5 : vector<1x32xf32> to vector<8x32xf32>
    %92 = arith.addf %90, %91 : vector<8x32xf32>
    %93 = arith.truncf %92 : vector<8x32xf32> to vector<8x32xbf16>
    %c0_29 = arith.constant 0 : index
    %c0_30 = arith.constant 0 : index
    %94 = vector.load %arg8[%c0_29, %c0_30] : memref<32x128xbf16, #tpu.memory_space<vmem>>, vector<32x128xbf16>
    %cst_31 = arith.constant dense<0.000000e+00> : vector<8x128xf32>
    %95 = tpu.matmul %93, %94, %cst_31 {dimension_numbers = #tpu.dot_dimension_numbers<[1], [0], [0], [1], [0, 0, 1, 1], [], []>} : vector<8x32xbf16>, vector<32x128xbf16>, vector<8x128xf32> -> vector<8x128xf32>
    %c0_32 = arith.constant 0 : index
    %c0_33 = arith.constant 0 : index
    %96 = vector.load %arg4[%c0_32, %c0_33] : memref<1x128xf32, #tpu.memory_space<vmem>>, vector<1x128xf32>
    %97 = vector.broadcast %96 : vector<1x128xf32> to vector<8x128xf32>
    %98 = arith.addf %95, %97 : vector<8x128xf32>
    %cst_34 = arith.constant 0.000000e+00 : f32
    %99 = vector.broadcast %cst_34 : f32 to vector<8x128xf32>
    %100 = arith.maximumf %98, %99 : vector<8x128xf32>
    %101 = arith.truncf %100 : vector<8x128xf32> to vector<8x128xbf16>
    %c0_35 = arith.constant 0 : index
    %c0_36 = arith.constant 0 : index
    %102 = vector.load %arg9[%c0_35, %c0_36] : memref<128x32xbf16, #tpu.memory_space<vmem>>, vector<128x32xbf16>
    %cst_37 = arith.constant dense<0.000000e+00> : vector<8x32xf32>
    %103 = tpu.matmul %101, %102, %cst_37 {dimension_numbers = #tpu.dot_dimension_numbers<[1], [0], [0], [1], [0, 0, 1, 1], [], []>} : vector<8x128xbf16>, vector<128x32xbf16>, vector<8x32xf32> -> vector<8x32xf32>
    %104 = vector.broadcast %6 : vector<1x32xf32> to vector<8x32xf32>
    %105 = arith.addf %103, %104 : vector<8x32xf32>
    %106 = arith.addf %70, %105 : vector<8x32xf32>
    %c0_38 = arith.constant 0 : index
    %c0_39 = arith.constant 0 : index
    %c0_40 = arith.constant 0 : index
    %107 = vector.load %arg10[%c0_38, %c0_39, %c0_40] : memref<1x8x32xf32, #tpu.memory_space<vmem>>, vector<1x8x32xf32>
    %108 = vector.shape_cast %107 : vector<1x8x32xf32> to vector<8x32xf32>
    %109 = vector.shape_cast %106 : vector<8x32xf32> to vector<1x8x32xf32>
    tpu.vector_store %arg10[%c0_38, %c0_39, %c0_40], %109 {strides = array<i32>} : memref<1x8x32xf32, #tpu.memory_space<vmem>>, vector<1x8x32xf32>,
    return
  }
  func.func @transform_0(%arg0: i32, %arg1: i32) -> (i32, i32, i32) {
    %c0_i32 = arith.constant 0 : i32
    %c0_i32_0 = arith.constant 0 : i32
    %c0_i32_1 = arith.constant 0 : i32
    return %arg0, %c0_i32, %c0_i32_0 : i32, i32, i32
  }
  func.func @transform_1(%arg0: i32, %arg1: i32) -> (i32, i32) {
    %c0_i32 = arith.constant 0 : i32
    %c0_i32_0 = arith.constant 0 : i32
    %c0_i32_1 = arith.constant 0 : i32
    return %c0_i32, %c0_i32_0 : i32, i32
  }
  func.func @transform_2(%arg0: i32, %arg1: i32) -> (i32, i32) {
    %c0_i32 = arith.constant 0 : i32
    %c0_i32_0 = arith.constant 0 : i32
    %c0_i32_1 = arith.constant 0 : i32
    return %c0_i32, %c0_i32_0 : i32, i32
  }
  func.func @transform_3(%arg0: i32, %arg1: i32) -> (i32, i32) {
    %c0_i32 = arith.constant 0 : i32
    %c0_i32_0 = arith.constant 0 : i32
    %c0_i32_1 = arith.constant 0 : i32
    return %c0_i32, %c0_i32_0 : i32, i32
  }
  func.func @transform_4(%arg0: i32, %arg1: i32) -> (i32, i32) {
    %c0_i32 = arith.constant 0 : i32
    %c0_i32_0 = arith.constant 0 : i32
    %c0_i32_1 = arith.constant 0 : i32
    return %c0_i32, %c0_i32_0 : i32, i32
  }
  func.func @transform_5(%arg0: i32, %arg1: i32) -> (i32, i32) {
    %c0_i32 = arith.constant 0 : i32
    %c0_i32_0 = arith.constant 0 : i32
    %c0_i32_1 = arith.constant 0 : i32
    return %c0_i32, %c0_i32_0 : i32, i32
  }
  func.func @transform_6(%arg0: i32, %arg1: i32) -> (i32, i32) {
    %c0_i32 = arith.constant 0 : i32
    %c0_i32_0 = arith.constant 0 : i32
    %c0_i32_1 = arith.constant 0 : i32
    return %c0_i32, %c0_i32_0 : i32, i32
  }
  func.func @transform_7(%arg0: i32, %arg1: i32) -> (i32, i32) {
    %c0_i32 = arith.constant 0 : i32
    %c0_i32_0 = arith.constant 0 : i32
    %c0_i32_1 = arith.constant 0 : i32
    return %c0_i32, %c0_i32_0 : i32, i32
  }
  func.func @transform_8(%arg0: i32, %arg1: i32) -> (i32, i32, i32) {
    %c0_i32 = arith.constant 0 : i32
    %c0_i32_0 = arith.constant 0 : i32
    return %arg0, %arg1, %c0_i32 : i32, i32, i32
  }
}

</mosaic_0001>

<bundles_post_ra>
// kernel: tpu_custom_call.1
= control target key start
LH: loop header
LB: loop body
LE: loop exit
PB: predicated region body
PF: predicated region fallthrough
CT: control target
= control target key end

     0   :  { %13 = vsyncpa [#allocation4], 0  ;;  %s3064_s0 = inlined_call_operand.vmem [shape: f32[2,8,32], index: 0, kind: input, shape index: {}]   ;;  %s3065_s1 = inlined_call_operand.hbm [shape: f32[6,32], index: 1, kind: input, shape index: {}]   ;;  %s3066_s2 = inlined_call_operand.vmem [shape: f32[1,128], index: 2, kind: input, shape index: {}]   ;;  %s3067_s3 = inlined_call_operand.vmem [shape: bf16[32,32], index: 3, kind: input, shape index: {}]   ;;  %s3068_s4 = inlined_call_operand.vmem [shape: bf16[32,64], index: 4, kind: input, shape index: {}]   ;;  %s3069_s5 = inlined_call_operand.vmem [shape: bf16[32,32], index: 5, kind: input, shape index: {}]   ;;  %s3070_s6 = inlined_call_operand.vmem [shape: bf16[32,128], index: 6, kind: input, shape index: {}]   ;;  %s3071_s7 = inlined_call_operand.vmem [shape: bf16[128,32], index: 7, kind: input, shape index: {}]   ;;  %s3072_s8 = inlined_call_operand.hbm [shape: f32[2,8,32], index: 8, kind: output, shape index: {}]  }
   0x1   :  { %14 = vsyncpa [#allocation5], 0 }
   0x2   :  { %16 = vsyncpa [#allocation5 + $0x1], 0  ;;  %s2660_s27 = smov 0   ;;  %s2662_s28 = smov 0  }
   0x3   :  { %s2664_s29 = smov 0   ;;  %s2666_s30 = smov 0  }
   0x4   :  { %s2668_s9 = smov 0   ;;  %s2670_s10 = smov 0  }
   0x5 LB: > { %s2178_s11 = sadd.s32 4294967295, %s2599_s10   ;;  %s2179_s12 = sadd.s32 4294967294, %s2599_s10   ;;  %s2599_s10 = sphi %s2670_s10, %s22_s10   ;;  %s2595_s9 = sphi %s2668_s9, %s3081_s9   ;;  %s2591_s30 = sphi %s2666_s30, %s3080_s30   ;;  %s2587_s29 = sphi %s2664_s29, %s3079_s29   ;;  %s2583_s28 = sphi %s2662_s28, %s3078_s28   ;;  %s2579_s27 = sphi %s2660_s27, %s3077_s27  }
   0x6   : > { %s34_s13 = sadd.s32 1, %s2595_s9  ;;  %s216_s14 = sadd.s32 1, %s2587_s29 }
   0x7   : > { %p36_p0 = scmp.ge.s32.totalorder %s34_s13, 2  ;;  %p226_p1 = scmp.ne.s32.totalorder %s2587_s29, %s2583_s28 }
   0x8   : > { %p227_p2 = scmp.eq.s32.totalorder %s2178_s11, 1  ;;  %p232_p3 = scmp.ne.s32.totalorder %s2583_s28, %s2579_s27 }
   0x9   : > { %s3083_s13 = smov (%p36_p0, %s34_s13), 0  ;;  %p233_p5 = scmp.eq.s32.totalorder %s2179_s12, 1 }
   0xa   : > { %p2700_p4 = por %p227_p2, %p226_p1  ;;  %s211_s16 = ssub.s32 %s2595_s9, %s3083_s13 }
   0xb   : > { %p2180_p6 = scmp.ge.s32.totalorder %s2599_s10, 1  ;;  %p214_p7 = scmp.eq.s32.totalorder %s211_s16, 0 }
   0xc   : > { %p2707_p8 = por %p233_p5, %p232_p3  ;;  %p240_p9 = scmp.lt.s32.totalorder %s2599_s10, 3 }
   0xd   : > { %s2713_s18 = scalar_select %p214_p7, %s2587_s29, %s216_s14  }
   0xe   : > { %p2715_p10 = pnand %p2180_p6, %p240_p9  ;;  %p2719_p11 = scmp.eq.s32.totalorder %s2178_s11, 0 }
   0xf   : > { %s2601_s21 = smov [#allocation3]  }
  0x10   : > { %p2380_p12 = pneg %p2715_p10  ;;  %s260_s22 = sshll.u32 %s2601_s21, 4  ;;  %s261_s22 = int_to_ptr.vmem [resolvable:$true] %s260_s22 }
  0x11   : > { %s2504_s23 = scalar_lea.vmem %s261_s22, 128  ;;  %p2512_p5 = scmp.lt.s32.totalorder %s261_s22, %s261_s22 }
  0x12   : > { %p2381_p13 = pnand %p2719_p11, %p2380_p12  ;;  %p2505_p1 = scmp.ne.s32.totalorder %s261_s22, %s2504_s23 }
  0x13   : > { %p2513_p6 = scmp.lt.s32.totalorder %s2504_s23, %s2504_s23 }
  0x14   : > { %p2495_p0 = pneg %p2381_p13 }
  0x15   : > { %p2514_p7 = por %p2513_p6, %p2512_p5 }
  0x16   : > { %p2507_p2 = pnand %p2505_p1, %p2495_p0 }
  0x18   : > { %p2508_p3 = pneg %p2507_p2 }
  0x1a   : > { %p2515_p9 = pnand %p2514_p7, %p2508_p3 }
  0x1c   : > { %2518 = shalt.err (!%p2515_p9)
}
  0x1d   : > { %2383 = dma.hbm_to_vmem [thread:$0]  (!%p2381_p13), %s3065_s1, 128, %s261_s22, [#allocation4]  }
  0x1e   : > { %291 = sbr.rel (%p2715_p10) target bundleno = 2606 (0xa2e), region = 52 }
  0x23   : > { %2570 = dma.done.wait (%p2719_p11), [#allocation4], 128  }
  0x24   : > { %2572 = vsyncadd (%p2719_p11), [#allocation4], 4294967168  ;;  %p324_p12 = scmp.lt.s32.totalorder %s2591_s30, 1  ;;  %vm335_vm0 = vcmask 261120   ;;  %v2453_v12 = vld [vmem:[%s3068_s4] sm:$0xff]   ;;  %v2454_v13 = vld [vmem:[%s3068_s4 + $0x8] sm:$0xff]   ;;  %v350_v22 = vlaneseq }
  0x25   : > { %v2602_v14 = vmov 0.0   ;;  %vm2603_vm1 = vmmov 0   ;;  %v2455_v15 = vld [vmem:[%s3068_s4] sm:$0xff]   ;;  %s2604_s25 = smov 96   ;;  %v2452_v16 = vld [vmem:[%s3068_s4 + $0x8] sm:$0xff]   ;;  %vm421_vm2 = vcmask 257024  }
  0x26   : > { %s325_s26 = scalar_select %p324_p12, %s2591_s30, 1  ;;  %2266 = vmatprep.subr.bf16.mxu0 %v2602_v14  ;;  %2270 = vmatprep.mubr.msk.bf16.mxu0 %vm2603_vm1, %v2602_v14  ;;  %v2767_v24 = vshrl.u32 %v350_v22, 7  ;;  %v2770_v26 = vld [vmem:[#allocation3] sm:$0x3f]  ;;  %v2457_v42 = vld [vmem:[%s3067_s3] sm:$0xff]   ;;  %vm1182_vm3 = vcmask 1043456  }
  0x27   : > { %2267 = vmatpush3.bf16.msra.mxu0 %v2454_v13  ;;  %2290 = vmatprep.subr.bf16.mxu1 %v2602_v14  ;;  %v2456_v40 = vld [vmem:[%s3067_s3 + $0x8] sm:$0xff]   ;;  %s2605_s21 = smov 104   ;;  %s2606_s22 = smov 120   ;;  %v2608_v59 = vmov 1983009808   ;;  %vm1178_vm4 = vcmask 64512  }
  0x28   : > { %s2185_s11 = sshll.u32 %s325_s26, 3  ;;  %2268 = vmatprep.subr.bf16.mxu0 %v2602_v14  ;;  %2292 = vmatprep.mubr.msk.bf16.mxu1 %vm2603_vm1, %v2602_v14  ;;  %v352_v25 = vsub.s32 0, %v2767_v24  ;;  %v357_v27 = vsub.s32 1, %v2767_v24  ;;  %s2607_s23 = smov 112   ;;  %v605_v60 = vunpack.c.l.s4 %v2608_v59  ;;  %v2609_v62 = vmov 1934713408  }
  0x29   : > { %s2741_s16 = scalar_lea.vmem %s3064_s0, %s2185_s11  ;;  %v622_v63 = vunpack.c.l.s4 %v2609_v62  ;;  %s2611_s12 = smov 16   ;;  %vm1807_vm5 = vcmask 130048   ;;  %vm1809_vm6 = vcmask 195584  }
  0x2a   : > { %v334_v0 = vld [vmem:[%s2741_s16] sm:$0xff]  ;;  %v353_v28 = vrot.slane %v2770_v26, %v352_v25  ;;  %v358_v31 = vrot.slane %v2770_v26, %v357_v27  ;;  %v606_v61 = vunpack.c.0.s8 %v605_v60  ;;  %v2610_v27 = vmov 0   ;;  %s2612_s14 = smov 8   ;;  %s2613_s19 = smov 24  }
  0x2b   : > { %v336_v1 = vsel %vm335_vm0, %v334_v0, 0.0  ;;  %2269 = vmatpush3.bf16.msra.mxu0 %v2455_v15  ;;  %s2223_s20 = sshll.u32 %s2591_s30, 7  ;;  %s2614_s26 = smov [#allocation6]  }
  0x2c   : > { %337 = vadd.xlane.f32.xlu0 %v336_v1  ;;  %491 = vadd.xlane.f32.xlu1 %v336_v1  ;;  %s3017_s24 = scalar_lea.hbm %s3072_s8, %s2223_s20  ;;  %s2523_s11 = sshll.u32 %s2614_s26, 4  ;;  %s2524_s11 = int_to_ptr.vmem [resolvable:$false] %s2523_s11 }
  0x2d   : > { %2274 = vmatprep.subr.bf16.mxu0 %v2602_v14 }
  0xb5   : > { %v338_v2 = vpop.xlane.xlu0 %337  ;;  %v492_v3 = vpop.xlane.xlu1 %491 }
  0xb6   : > { %v340_v4 = vmul.f32 0.03125, %v338_v2  ;;  %v494_v5 = vmul.f32 0.03125, %v492_v3  ;;  %v2798_v3 = vsub.s32 %v606_v61, %v2767_v24 }
  0xb8   : > { %v341_v6 = vsub.f32 %v334_v0, %v340_v4  ;;  %v495_v7 = vsub.f32 %v334_v0, %v494_v5  ;;  %v623_v4 = vunpack.c.0.s8 %v622_v63 }
  0xba   : > { %v342_v8 = vmul.f32 %v341_v6, %v341_v6  ;;  %v496_v9 = vmul.f32 %v495_v7, %v495_v7 }
  0xbc   : > { %v343_v10 = vsel %vm335_vm0, %v342_v8, 0.0  ;;  %v497_v11 = vsel %vm335_vm0, %v496_v9, 0.0 }
  0xbd   : > { %344 = vadd.xlane.f32.xlu0 %v343_v10  ;;  %498 = vadd.xlane.f32.xlu1 %v497_v11 }
  0xce   : > { %437 = vrot.lane.b32.xlu1 %v2453_v12, %s2604_s25  ;;  %v2801_v12 = vsub.s32 %v623_v4, %v2767_v24 }
  0xd3   : > { %439 = vrot.lane.b32.xlu0 %v2452_v16, %s2604_s25 }
 0x146   : > { %v345_v17 = vpop.xlane.xlu0 %344  ;;  %v499_v19 = vpop.xlane.xlu1 %498 }
 0x147   : > { %v346_v18 = vmul.f32 0.03125, %v345_v17  ;;  %v500_v21 = vmul.f32 0.03125, %v499_v19 }
 0x149   : > { %v347_v20 = vadd.f32 1e-05, %v346_v18  ;;  %v501_v23 = vadd.f32 1e-05, %v500_v21 }
 0x14a   : > { %v440_v35 = vpop.permute.xlu0 %439  ;;  %v438_v38 = vpop.permute.xlu1 %437 }
 0x14b   : > { %2470 = vrsqrt.f32 %v347_v20 }
 0x14c   : > { %2472 = vrsqrt.f32 %v501_v23 }
 0x158   : > { %v2471_v29 = vpop.eup %2470 }
 0x159   : > { %v349_v30 = vmul.f32 %v2471_v29, %v341_v6  ;;  %v2473_v34 = vpop.eup %2472 }
 0x15a   : > { %v503_v37 = vmul.f32 %v2473_v34, %v495_v7 }
 0x15b   : > { %v354_v32 = vmul.f32 %v353_v28, %v349_v30 }
 0x15c   : > { %v508_v39 = vmul.f32 %v503_v37, %v353_v28 }
 0x15d   : > { %v359_v33 = vadd.f32 %v358_v31, %v354_v32 }
 0x15e   : > { %v513_v41 = vadd.f32 %v508_v39, %v358_v31 }
 0x15f   : > { %v360_v36 = vpack.c.bf16 %v359_v33, %v359_v33 }
 0x160   : > { %v514_v43 = vpack.c.bf16 %v513_v41, %v513_v41 }
 0x161   : > { %2271 = vmatmul.mubr.msk.bf16.vlgmr.msra.gmra.mxu0 %vm335_vm0, %v360_v36 }
 0x162   : > { %2275 = vmatpush3.bf16.msra.mxu0 %v440_v35  ;;  %2278 = vmatprep.mubr.msk.bf16.mxu0 %vm2603_vm1, %v2602_v14 }
 0x163   : > { %2276 = vmatprep.subr.bf16.mxu0 %v2602_v14 }
 0x166   : > { %2277 = vmatpush3.bf16.msra.mxu0 %v438_v38 }
 0x167   : > { %2282 = vmatprep.subr.bf16.mxu0 %v2602_v14 }
 0x169   : > { %2279 = vmatmul.mubr.msk.bf16.vlgmr.msra.gmra.mxu0 %vm335_vm0, %v360_v36 }
 0x16a   : > { %2283 = vmatpush3.bf16.msra.mxu0 %v2456_v40  ;;  %2286 = vmatprep.mubr.msk.bf16.mxu0 %vm2603_vm1, %v2602_v14 }
 0x16b   : > { %2284 = vmatprep.subr.bf16.mxu0 %v2602_v14 }
 0x16e   : > { %2285 = vmatpush3.bf16.msra.mxu0 %v2457_v42 }
 0x16f   : > { %2296 = vmatprep.subr.bf16.mxu0 %v2602_v14 }
 0x171   : > { %2287 = vmatmul.mubr.msk.bf16.vlgmr.msra.gmra.mxu0 %vm335_vm0, %v514_v43 }
 0x172   : > { %2298 = vmatprep.mubr.msk.bf16.mxu0 %vm2603_vm1, %v2602_v14 }
 0x221   : > { %v414_v44 = vpop.f32.mrf.mxu0 }
 0x222   : > { %v420_v45 = vpack.c.bf16 %v414_v44, %v414_v44 }
 0x223   : > { %v2272_v46 = vpop.f32.mrf.mxu0 }
 0x224   : > { %422 = vst.msk [vmem:[#allocation2] sm:$0xf] %vm421_vm2, %v420_v45 }
 0x225   : > { %v417_v47 = vpop.f32.mrf.mxu0 }
 0x227   : > { %v2273_v48 = vpop.f32.mrf.mxu0 }
 0x229   : > { %v477_v49 = vpop.f32.mrf.mxu0 }
 0x22a   : > { %v483_v50 = vpack.c.bf16 %v477_v49, %v477_v49 }
 0x22b   : > { %v2280_v51 = vpop.f32.mrf.mxu0  ;;  %v583_v52 = vld [vmem:[#allocation2] sm:$0xf] }
 0x22c   : > { %485 = vst.msk [vmem:[#allocation2 + $0x4] sm:$0xf] %vm421_vm2, %v483_v50  ;;  %589 = vrot.lane.b32.xlu0 %v583_v52, %s2605_s21  ;;  %585 = vrot.lane.b32.xlu1 %v583_v52, %s2606_s22  ;;  %v594_v6 = vshrl.u32 %v583_v52, 16 }
 0x22d   : > { %v480_v53 = vpop.f32.mrf.mxu0 }
 0x22f   : > { %v2281_v54 = vpop.f32.mrf.mxu0 }
 0x230   : > { %587 = vrot.lane.b32.xlu1 %v583_v52, %s2607_s23 }
 0x231   : > { %v568_v55 = vpop.f32.mrf.mxu0 }
 0x232   : > { %v574_v30 = vmul.f32 0.35355338, %v568_v55 }
 0x233   : > { %v2288_v56 = vpop.f32.mrf.mxu0 }
 0x234   : > { %v2813_v33 = vpack.c.bf16 %v574_v30, %v574_v30 }
 0x235   : > { %v571_v57 = vpop.f32.mrf.mxu0 }
 0x237   : > { %v2289_v58 = vpop.f32.mrf.mxu0 }
 0x29e   : > { %v586_v0 = vpop.permute.xlu1 %585  ;;  %v590_v2 = vpop.permute.xlu0 %589 }
 0x29f   : > { %v595_v1 = vshrl.u32 %v586_v0, 16  ;;  %v593_v5 = vpack.i.b16 %v586_v0, %v583_v52  ;;  %v601_v8 = vshrl.u32 %v590_v2, 16 }
 0x2a1   : > { %v596_v9 = vpack.i.b16 %v595_v1, %v594_v6  ;;  %v610_v13 = vrot.slane %v593_v5, %v2798_v3 }
 0x2a2   : > { %v588_v7 = vpop.permute.xlu1 %587 }
 0x2a3   : > { %v599_v10 = vpack.i.b16 %v590_v2, %v588_v7  ;;  %v600_v11 = vshrl.u32 %v588_v7, 16  ;;  %v644_v18 = vrot.slane %v596_v9, %v2798_v3 }
 0x2a5   : > { %v602_v15 = vpack.i.b16 %v601_v8, %v600_v11  ;;  %v618_v16 = vrot.slane %v599_v10, %v2798_v3 }
 0x2a7   : > { %v619_v17 = vcombine.low %v610_v13, %v618_v16  ;;  %v652_v19 = vrot.slane %v602_v15, %v2798_v3  ;;  %v620_v22 = vcombine.high %v610_v13, %v618_v16 }
 0x2a9   : > { %v627_v20 = vrot.slane %v619_v17, %v2801_v12  ;;  %v653_v21 = vcombine.low %v644_v18, %v652_v19  ;;  %v634_v25 = vrot.slane %v620_v22, %v2801_v12  ;;  %v654_v29 = vcombine.high %v644_v18, %v652_v19  ;;  %v2835_v19 = vld [vmem:[#allocation2 + $0x4] sm:$0xf] }
 0x2ab   : > { %760 = vxpose.xlu1.c.b16.start.end [1/1] (short) (narrow) %v627_v20, 16  ;;  %v661_v23 = vrot.slane %v653_v21, %v2801_v12  ;;  %v635_v28 = vcombine.high %v627_v20, %v2610_v27  ;;  %v636_v31 = vcombine.high %v634_v25, %v2610_v27  ;;  %v668_v32 = vrot.slane %v654_v29, %v2801_v12 }
 0x2ad   : > { %776 = vxpose.xlu0.c.b16.start.end [1/1] (short) (narrow) %v661_v23, 16  ;;  %v669_v34 = vcombine.high %v661_v23, %v2610_v27  ;;  %v670_v35 = vcombine.high %v668_v32, %v2610_v27 }
 0x2af   : > { %824 = vxpose.xlu1.c.b16.start.end [1/1] (short) (narrow) %v634_v25, 16 }
 0x2b1   : > { %792 = vxpose.xlu0.c.b16.start.end [1/1] (short) (narrow) %v635_v28, 16 }
 0x2b3   : > { %856 = vxpose.xlu1.c.b16.start.end [1/1] (short) (narrow) %v636_v31, 16 }
 0x2b5   : > { %840 = vxpose.xlu0.c.b16.start.end [1/1] (short) (narrow) %v668_v32, 16 }
 0x2b7   : > { %577 = vrot.lane.b32.xlu1 %v2813_v33, %s2606_s22 }
 0x2b9   : > { %808 = vxpose.xlu0.c.b16.start.end [1/1] (short) (narrow) %v669_v34, 16 }
 0x2bd   : > { %872 = vxpose.xlu0.c.b16.start.end [1/1] (short) (narrow) %v670_v35, 16 }
 0x30d   : > { %v768_v36 = vpop.trf.xlu1 }
 0x30f   : > { %v784_v37 = vpop.trf.xlu0 }
 0x311   : > { %v832_v38 = vpop.trf.xlu1 }
 0x312   : > { %v888_v42 = vcombine.low %v768_v36, %v832_v38 }
 0x313   : > { %v800_v39 = vpop.trf.xlu0 }
 0x314   : > { %v895_v45 = vrot.slane %v888_v42, %v2798_v3 }
 0x315   : > { %v864_v40 = vpop.trf.xlu1 }
 0x316   : > { %v896_v43 = vcombine.low %v800_v39, %v864_v40 }
 0x317   : > { %v848_v41 = vpop.trf.xlu0 }
 0x318   : > { %v903_v46 = vrot.slane %v896_v43, %v2798_v3  ;;  %v922_v47 = vcombine.low %v784_v37, %v848_v41 }
 0x31a   : > { %v904_v49 = vcombine.low %v895_v45, %v903_v46  ;;  %v929_v51 = vrot.slane %v922_v47, %v2798_v3  ;;  %v905_v56 = vcombine.high %v895_v45, %v903_v46 }
 0x31b   : > { %v816_v44 = vpop.trf.xlu0 }
 0x31c   : > { %v912_v55 = vrot.slane %v904_v49, %v2801_v12  ;;  %v919_v63 = vrot.slane %v905_v56, %v2801_v12 }
 0x31e   : > { %v960_v59 = vshrl.u32 %v912_v55, 16  ;;  %v920_v2 = vcombine.high %v912_v55, %v2610_v27  ;;  %v976_v6 = vshrl.u32 %v919_v63, 16  ;;  %v921_v9 = vcombine.high %v919_v63, %v2610_v27 }
 0x31f   : > { %v880_v48 = vpop.trf.xlu0 }
 0x320   : > { %v930_v50 = vcombine.low %v816_v44, %v880_v48  ;;  %v968_v13 = vshrl.u32 %v920_v2, 16  ;;  %v984_v17 = vshrl.u32 %v921_v9, 16 }
 0x322   : > { %v937_v52 = vrot.slane %v930_v50, %v2798_v3 }
 0x324   : > { %v938_v53 = vcombine.low %v929_v51, %v937_v52  ;;  %v939_v54 = vcombine.high %v929_v51, %v937_v52 }
 0x326   : > { %v946_v57 = vrot.slane %v938_v53, %v2801_v12  ;;  %v953_v61 = vrot.slane %v939_v54, %v2801_v12 }
 0x328   : > { %v958_v58 = vpack.i.b16 %v946_v57, %v912_v55  ;;  %v961_v60 = vshrl.u32 %v946_v57, 16  ;;  %v974_v0 = vpack.i.b16 %v953_v61, %v919_v63  ;;  %v954_v1 = vcombine.high %v946_v57, %v2610_v27 }
 0x329   : > { %v977_v5 = vshrl.u32 %v953_v61, 16  ;;  %v955_v8 = vcombine.high %v953_v61, %v2610_v27  ;;  %v578_v25 = vpop.permute.xlu1 %577 }
 0x32a   : > { %988 = vxpose.xlu0.c.b16.start.end [1/1] (short) (narrow) %v958_v58, 16  ;;  %v962_v62 = vpack.i.b16 %v961_v60, %v960_v59  ;;  %v966_v4 = vpack.i.b16 %v954_v1, %v920_v2  ;;  %v969_v11 = vshrl.u32 %v954_v1, 16 }
 0x32b   : > { %v978_v7 = vpack.i.b16 %v977_v5, %v976_v6  ;;  %v982_v10 = vpack.i.b16 %v955_v8, %v921_v9  ;;  %v985_v16 = vshrl.u32 %v955_v8, 16 }
 0x32c   : > { %1004 = vxpose.xlu1.c.b16.start.end [1/1] (short) (narrow) %v962_v62, 16  ;;  %v970_v15 = vpack.i.b16 %v969_v11, %v968_v13 }
 0x32d   : > { %v986_v18 = vpack.i.b16 %v985_v16, %v984_v17 }
 0x32e   : > { %1052 = vxpose.xlu0.c.b16.start.end [1/1] (short) (narrow) %v974_v0, 16 }
 0x330   : > { %581 = vrot.lane.b32.xlu1 %v2813_v33, %s2605_s21 }
 0x332   : > { %1020 = vxpose.xlu0.c.b16.start.end [1/1] (short) (narrow) %v966_v4, 16 }
 0x336   : > { %1068 = vxpose.xlu0.c.b16.start.end [1/1] (short) (narrow) %v978_v7, 16 }
 0x33a   : > { %1084 = vxpose.xlu0.c.b16.start.end [1/1] (short) (narrow) %v982_v10, 16 }
 0x33e   : > { %1036 = vxpose.xlu0.c.b16.start.end [1/1] (short) (narrow) %v970_v15, 16 }
 0x342   : > { %1100 = vxpose.xlu0.c.b16.start.end [1/1] (short) (narrow) %v986_v18, 16 }
 0x34b   : > { %579 = vrot.lane.b32.xlu0 %v2813_v33, %s2607_s23 }
 0x34f   : > { %674 = vrot.lane.b32.xlu0 %v2835_v19, %s2606_s22 }
 0x38c   : > { %v996_v20 = vpop.trf.xlu0 }
 0x38e   : > { %v1012_v34 = vpop.trf.xlu1 }
 0x390   : > { %v1060_v21 = vpop.trf.xlu0 }
 0x391   : > { %v1116_v28 = vcombine.low %v996_v20, %v1060_v21 }
 0x393   : > { %v1123_v32 = vrot.slane %v1116_v28, %v2798_v3 }
 0x394   : > { %v1028_v22 = vpop.trf.xlu0 }
 0x398   : > { %v1076_v23 = vpop.trf.xlu0 }
 0x399   : > { %v1141_v37 = vcombine.low %v1012_v34, %v1076_v23 }
 0x39b   : > { %v1148_v41 = vrot.slane %v1141_v37, %v2798_v3 }
 0x39c   : > { %v1092_v29 = vpop.trf.xlu0 }
 0x39d   : > { %v1124_v30 = vcombine.low %v1028_v22, %v1092_v29 }
 0x39f   : > { %v1131_v31 = vrot.slane %v1124_v30, %v2798_v3  ;;  %v683_v30 = vshrl.u32 %v2835_v19, 16 }
 0x3a0   : > { %v1044_v35 = vpop.trf.xlu0 }
 0x3a1   : > { %v1132_v36 = vcombine.low %v1123_v32, %v1131_v31 }
 0x3a3   : > { %v1139_v40 = vrot.slane %v1132_v36, %v2801_v12 }
 0x3a4   : > { %v1108_v38 = vpop.trf.xlu0 }
 0x3a5   : > { %v1149_v39 = vcombine.low %v1044_v35, %v1108_v38  ;;  %v1140_v44 = vcombine.high %v1139_v40, %v2610_v27  ;;  %v1169_v47 = vshrl.u32 %v1139_v40, 16 }
 0x3a7   : > { %v1156_v42 = vrot.slane %v1149_v39, %v2798_v3  ;;  %v1175_v50 = vshrl.u32 %v1140_v44, 16 }
 0x3a9   : > { %v1157_v43 = vcombine.low %v1148_v41, %v1156_v42 }
 0x3ab   : > { %v1164_v45 = vrot.slane %v1157_v43, %v2801_v12 }
 0x3ad   : > { %v1168_v46 = vpack.i.b16 %v1164_v45, %v1139_v40  ;;  %v1170_v48 = vshrl.u32 %v1164_v45, 16  ;;  %v1165_v49 = vcombine.high %v1164_v45, %v2610_v27 }
 0x3af   : > { %v1184_v51 = vsel %vm1182_vm3, %v1168_v46, 0  ;;  %v1171_v52 = vpack.i.b16 %v1170_v48, %v1169_v47  ;;  %v1174_v53 = vpack.i.b16 %v1165_v49, %v1140_v44  ;;  %v1176_v54 = vshrl.u32 %v1165_v49, 16 }
 0x3b0   : > { %2291 = vmatpush3.bf16.msra.mxu1 %v1184_v51 }
 0x3b1   : > { %v1230_v55 = vsel %vm1182_vm3, %v1171_v52, 0  ;;  %2302 = vmatprep.subr.bf16.mxu1 %v2602_v14  ;;  %v1177_v56 = vpack.i.b16 %v1176_v54, %v1175_v50  ;;  %v1276_v57 = vsel %vm1182_vm3, %v1174_v53, 0 }
 0x3b2   : > { %2297 = vmatpush3.bf16.msra.mxu0 %v1230_v55 }
 0x3b3   : > { %2293 = vmatmul.mubr.msk.bf16.vlgmr.msra.gmra.mxu1 %vm1178_vm4, %v2813_v33  ;;  %2308 = vmatprep.subr.bf16.mxu0 %v2602_v14  ;;  %v1322_v58 = vsel %vm1182_vm3, %v1177_v56, 0  ;;  %v582_v33 = vpop.permute.xlu1 %581 }
 0x3b4   : > { %2303 = vmatpush3.bf16.msra.mxu1 %v1276_v57  ;;  %2304 = vmatprep.mubr.msk.bf16.mxu1 %vm2603_vm1, %v2602_v14 }
 0x3b5   : > { %2299 = vmatmul.mubr.msk.bf16.vlgmr.msra.gmra.mxu0 %vm1178_vm4, %v578_v25  ;;  %2314 = vmatprep.subr.bf16.mxu1 %v2602_v14 }
 0x3b6   : > { %2309 = vmatpush3.bf16.msra.mxu0 %v1322_v58  ;;  %2310 = vmatprep.mubr.msk.bf16.mxu0 %vm2603_vm1, %v2602_v14 }
 0x3b7   : > { %2320 = vmatprep.subr.bf16.mxu0 %v2602_v14 }
 0x3bd   : > { %v580_v59 = vpop.permute.xlu0 %579  ;;  %2311 = vmatmul.mubr.msk.bf16.vlgmr.msra.gmra.mxu0 %vm1178_vm4, %v582_v33 }
 0x3be   : > { %2305 = vmatmul.mubr.msk.bf16.vlgmr.msra.gmra.mxu1 %vm1178_vm4, %v580_v59  ;;  %2322 = vmatprep.mubr.msk.bf16.mxu0 %vm2603_vm1, %v2602_v14 }
 0x3bf   : > { %2316 = vmatprep.mubr.msk.bf16.mxu1 %vm2603_vm1, %v2602_v14 }
 0x3c1   : > { %v675_v20 = vpop.permute.xlu0 %674 }
 0x3c2   : > { %v684_v23 = vshrl.u32 %v675_v20, 16  ;;  %v682_v32 = vpack.i.b16 %v675_v20, %v2835_v19 }
 0x3c4   : > { %v685_v35 = vpack.i.b16 %v684_v23, %v683_v30  ;;  %v699_v40 = vrot.slane %v682_v32, %v2798_v3 }
 0x3c6   : > { %v733_v43 = vrot.slane %v685_v35, %v2798_v3 }
 0x473   : > { %v1220_v60 = vpop.f32.mrf.mxu1 }
 0x474   : > { %v1364_v61 = vsel %vm1178_vm4, %v1220_v60, -inf }
 0x475   : > { %1365 = vmax.xlane.f32.xlu0 %v1364_v61  ;;  %v2294_v62 = vpop.f32.mrf.mxu1  ;;  %v1266_v63 = vpop.f32.mrf.mxu0 }
 0x476   : > { %v1367_v0 = vsel %vm1178_vm4, %v1266_v63, -inf }
 0x477   : > { %v1223_v1 = vpop.f32.mrf.mxu1  ;;  %1368 = vmax.xlane.f32.xlu1 %v1367_v0  ;;  %v2300_v2 = vpop.f32.mrf.mxu0 }
 0x479   : > { %v2295_v4 = vpop.f32.mrf.mxu1  ;;  %v1269_v5 = vpop.f32.mrf.mxu0 }
 0x47b   : > { %v2301_v6 = vpop.f32.mrf.mxu0 }
 0x47d   : > { %v2870_v7 = vpop.f32.mrf.mxu0 }
 0x47e   : > { %v2872_v8 = vpop.f32.mrf.mxu1  ;;  %v1373_v17 = vsel %vm1178_vm4, %v2870_v7, -inf }
 0x47f   : > { %v2312_v9 = vpop.f32.mrf.mxu0  ;;  %v1370_v18 = vsel %vm1178_vm4, %v2872_v8, -inf }
 0x480   : > { %v2306_v10 = vpop.f32.mrf.mxu1 }
 0x481   : > { %v1361_v11 = vpop.f32.mrf.mxu0 }
 0x482   : > { %v1315_v13 = vpop.f32.mrf.mxu1 }
 0x483   : > { %v2313_v15 = vpop.f32.mrf.mxu0 }
 0x484   : > { %v2307_v16 = vpop.f32.mrf.mxu1 }
 0x488   : > { %676 = vrot.lane.b32.xlu1 %v2835_v19, %s2607_s23 }
 0x48b   : > { %678 = vrot.lane.b32.xlu0 %v2835_v19, %s2605_s21 }
 0x4aa   : > { %1374 = vmax.xlane.f32.xlu0 %v1373_v17 }
 0x4ac   : > { %1371 = vmax.xlane.f32.xlu1 %v1370_v18 }
 0x4fe   : > { %v1366_v21 = vpop.xlane.xlu0 %1365 }
 0x4ff   : > { %v1376_v22 = vsub.f32 %v1220_v60, %v1366_v21 }
 0x500   : > { %v1369_v25 = vpop.xlane.xlu1 %1368 }
 0x501   : > { %v1380_v28 = vmul.f32 1.442695, %v1376_v22  ;;  %v1377_v29 = vsub.f32 %v1266_v63, %v1369_v25 }
 0x502   : > { %v679_v31 = vpop.permute.xlu0 %678 }
 0x503   : > { %2474 = vpow2.f32 %v1380_v28  ;;  %v1382_v34 = vmul.f32 1.442695, %v1377_v29  ;;  %v690_v37 = vshrl.u32 %v679_v31, 16 }
 0x504   : > { %v677_v36 = vpop.permute.xlu1 %676 }
 0x505   : > { %2476 = vpow2.f32 %v1382_v34  ;;  %v688_v38 = vpack.i.b16 %v679_v31, %v677_v36  ;;  %v689_v39 = vshrl.u32 %v677_v36, 16 }
 0x507   : > { %v691_v41 = vpack.i.b16 %v690_v37, %v689_v39  ;;  %v707_v42 = vrot.slane %v688_v38, %v2798_v3 }
 0x509   : > { %v708_v44 = vcombine.low %v699_v40, %v707_v42  ;;  %v709_v45 = vcombine.high %v699_v40, %v707_v42  ;;  %v741_v46 = vrot.slane %v691_v41, %v2798_v3 }
 0x50b   : > { %v716_v19 = vrot.slane %v708_v44, %v2801_v12  ;;  %v723_v47 = vrot.slane %v709_v45, %v2801_v12  ;;  %v742_v48 = vcombine.low %v733_v43, %v741_v46  ;;  %v743_v49 = vcombine.high %v733_v43, %v741_v46 }
 0x50d   : > { %v750_v50 = vrot.slane %v742_v48, %v2801_v12  ;;  %v757_v51 = vrot.slane %v743_v49, %v2801_v12  ;;  %v1404_v52 = vcombine.low %v716_v19, %v723_v47  ;;  %v2199_v53 = vcombine.high %v716_v19, %v723_v47 }
 0x50f   : > { %v1411_v54 = vrot.slane %v1404_v52, %v2798_v3  ;;  %v1419_v55 = vrot.slane %v2199_v53, %v2798_v3  ;;  %v1429_v56 = vcombine.low %v750_v50, %v757_v51  ;;  %v2200_v57 = vcombine.high %v750_v50, %v757_v51 }
 0x510   : > { %v2475_v58 = vpop.eup %2474 }
 0x511   : > { %v1436_v33 = vrot.slane %v1429_v56, %v2798_v3  ;;  %v1444_v59 = vrot.slane %v2200_v57, %v2798_v3  ;;  %v1388_v60 = vsel %vm1178_vm4, %v2475_v58, 0.0  ;;  %v1420_v61 = vcombine.low %v1411_v54, %v1419_v55 }
 0x512   : > { %v2477_v62 = vpop.eup %2476  ;;  %1389 = vadd.xlane.f32.xlu0 %v1388_v60  ;;  %v1400_v20 = vpack.c.bf16 %v2475_v58, %v2475_v58 }
 0x513   : > { %v1391_v63 = vsel %vm1178_vm4, %v2477_v62, 0.0  ;;  %v1427_v0 = vrot.slane %v1420_v61, %v2801_v12  ;;  %v1445_v1 = vcombine.low %v1436_v33, %v1444_v59  ;;  %v1401_v23 = vpack.c.bf16 %v2477_v62, %v2477_v62 }
 0x514   : > { %1392 = vadd.xlane.f32.xlu1 %v1391_v63 }
 0x515   : > { %v1452_v2 = vrot.slane %v1445_v1, %v2801_v12  ;;  %v1428_v4 = vcombine.high %v1427_v0, %v2610_v27  ;;  %v1457_v6 = vshrl.u32 %v1427_v0, 16 }
 0x517   : > { %v1456_v5 = vpack.i.b16 %v1452_v2, %v1427_v0  ;;  %v1458_v9 = vshrl.u32 %v1452_v2, 16  ;;  %v1453_v10 = vcombine.high %v1452_v2, %v2610_v27  ;;  %v1463_v11 = vshrl.u32 %v1428_v4, 16 }
 0x519   : > { %v1470_v13 = vsel %vm1182_vm3, %v1456_v5, 0  ;;  %v1459_v15 = vpack.i.b16 %v1458_v9, %v1457_v6  ;;  %v1462_v16 = vpack.i.b16 %v1453_v10, %v1428_v4  ;;  %v1464_v17 = vshrl.u32 %v1453_v10, 16 }
 0x51a   : > { %2315 = vmatpush3.bf16.msra.mxu1 %v1470_v13 }
 0x51b   : > { %v1516_v18 = vsel %vm1182_vm3, %v1459_v15, 0  ;;  %2326 = vmatprep.subr.bf16.mxu1 %v2602_v14  ;;  %v1465_v21 = vpack.i.b16 %v1464_v17, %v1463_v11  ;;  %v1562_v22 = vsel %vm1182_vm3, %v1462_v16, 0  ;;  %v2458_v17 = vld [vmem:[%s3069_s5 + $0x8] sm:$0xff]  }
 0x51c   : > { %2321 = vmatpush3.bf16.msra.mxu0 %v1516_v18 }
 0x51d   : > { %2317 = vmatmul.mubr.msk.bf16.vlgmr.msra.gmra.mxu1 %vm1178_vm4, %v1400_v20  ;;  %2332 = vmatprep.subr.bf16.mxu0 %v2602_v14  ;;  %v1608_v27 = vsel %vm1182_vm3, %v1465_v21, 0 }
 0x51e   : > { %2327 = vmatpush3.bf16.msra.mxu1 %v1562_v22  ;;  %2328 = vmatprep.mubr.msk.bf16.mxu1 %vm2603_vm1, %v2602_v14 }
 0x51f   : > { %2323 = vmatmul.mubr.msk.bf16.vlgmr.msra.gmra.mxu0 %vm1178_vm4, %v1401_v23  ;;  %2338 = vmatprep.subr.bf16.mxu1 %v2602_v14 }
 0x520   : > { %2333 = vmatpush3.bf16.msra.mxu0 %v1608_v27  ;;  %2334 = vmatprep.mubr.msk.bf16.mxu0 %vm2603_vm1, %v2602_v14 }
 0x521   : > { %2346 = vmatprep.subr.bf16.mxu0 %v2602_v14 }
 0x533   : > { %v1375_v25 = vpop.xlane.xlu0 %1374 }
 0x534   : > { %v1379_v28 = vsub.f32 %v2870_v7, %v1375_v25 }
 0x535   : > { %v1372_v29 = vpop.xlane.xlu1 %1371 }
 0x536   : > { %v1386_v30 = vmul.f32 1.442695, %v1379_v28  ;;  %v1378_v31 = vsub.f32 %v2872_v8, %v1372_v29  ;;  %v2459_v29 = vld [vmem:[%s3069_s5] sm:$0xff]  }
 0x538   : > { %2478 = vpow2.f32 %v1386_v30  ;;  %v1384_v32 = vmul.f32 1.442695, %v1378_v31 }
 0x53a   : > { %2480 = vpow2.f32 %v1384_v32 }
 0x545   : > { %v2479_v34 = vpop.eup %2478 }
 0x546   : > { %v1397_v35 = vsel %vm1178_vm4, %v2479_v34, 0.0  ;;  %v1403_v36 = vpack.c.bf16 %v2479_v34, %v2479_v34 }
 0x547   : > { %v2481_v37 = vpop.eup %2480  ;;  %1398 = vadd.xlane.f32.xlu1 %v1397_v35 }
 0x548   : > { %2335 = vmatmul.mubr.msk.bf16.vlgmr.msra.gmra.mxu0 %vm1178_vm4, %v1403_v36  ;;  %v1394_v38 = vsel %vm1178_vm4, %v2481_v37, 0.0  ;;  %v1402_v39 = vpack.c.bf16 %v2481_v37, %v2481_v37 }
 0x549   : > { %1395 = vadd.xlane.f32.xlu0 %v1394_v38  ;;  %2350 = vmatprep.mubr.msk.bf16.mxu0 %vm2603_vm1, %v2602_v14 }
 0x54a   : > { %2329 = vmatmul.mubr.msk.bf16.vlgmr.msra.gmra.mxu1 %vm1178_vm4, %v1402_v39 }
 0x54b   : > { %2342 = vmatprep.mubr.msk.bf16.mxu1 %vm2603_vm1, %v2602_v14  ;;  %2339 = vmatpush3.bf16.msra.mxu1 %v2458_v17 }
 0x54c   : > { %2340 = vmatprep.subr.bf16.mxu1 %v2602_v14 }
 0x54f   : > { %2341 = vmatpush3.bf16.msra.mxu1 %v2459_v29  ;;  %v2210_v29 = vld [vmem:[%s3066_s2] ss:$0 sm:$0xff] }
 0x550   : > { %2354 = vmatprep.subr.bf16.mxu1 %v2602_v14 }
 0x59b   : > { %v1390_v19 = vpop.xlane.xlu0 %1389 }
 0x59d   : > { %v1393_v46 = vpop.xlane.xlu1 %1392 }
 0x59e   : > { %2482 = vrcp.f32 %v1393_v46 }
 0x5ab   : > { %v2483_v49 = vpop.eup %2482 }
 0x5d0   : > { %v1399_v47 = vpop.xlane.xlu1 %1398 }
 0x5d1   : > { %2484 = vrcp.f32 %v1399_v47 }
 0x5d2   : > { %v1396_v48 = vpop.xlane.xlu0 %1395  ;;  %2486 = vrcp.f32 %v1390_v19 }
 0x5d3   : > { %2488 = vrcp.f32 %v1396_v48 }
 0x5dd   : > { %v1506_v7 = vpop.f32.mrf.mxu1 }
 0x5de   : > { %v2485_v50 = vpop.eup %2484 }
 0x5df   : > { %v2318_v8 = vpop.f32.mrf.mxu1  ;;  %v1552_v40 = vpop.f32.mrf.mxu0 }
 0x5e0   : > { %v2487_v52 = vpop.eup %2486  ;;  %v1655_v53 = vmul.f32 %v2483_v49, %v1552_v40  ;;  %v1818_v49 = vsub.s32 2, %v2767_v24 }
 0x5e1   : > { %v1509_v41 = vpop.f32.mrf.mxu1  ;;  %v2324_v42 = vpop.f32.mrf.mxu0  ;;  %v1654_v58 = vmul.f32 %v2487_v52, %v1506_v7 }
 0x5e2   : > { %v2489_v55 = vpop.eup %2488 }
 0x5e3   : > { %v2319_v43 = vpop.f32.mrf.mxu1  ;;  %v1555_v44 = vpop.f32.mrf.mxu0 }
 0x5e5   : > { %v2325_v45 = vpop.f32.mrf.mxu0 }
 0x608   : > { %v1644_v51 = vpop.f32.mrf.mxu0 }
 0x609   : > { %v1657_v54 = vmul.f32 %v2485_v50, %v1644_v51  ;;  %v1819_v50 = vrot.slane %v2770_v26, %v1818_v49 }
 0x60a   : > { %v1598_v56 = vpop.f32.mrf.mxu1  ;;  %v2336_v57 = vpop.f32.mrf.mxu0 }
 0x60b   : > { %v1674_v33 = vcombine.low %v1655_v53, %v1657_v54  ;;  %v1675_v59 = vcombine.high %v1655_v53, %v1657_v54  ;;  %v1656_v60 = vmul.f32 %v2489_v55, %v1598_v56  ;;  %v2492_v54 = vld [vmem:[%s2741_s16] sm:$0xff] }
 0x60c   : > { %v2330_v61 = vpop.f32.mrf.mxu1  ;;  %v1647_v62 = vpop.f32.mrf.mxu0 }
 0x60d   : > { %v1658_v63 = vcombine.low %v1654_v58, %v1656_v60  ;;  %v1659_v0 = vcombine.high %v1654_v58, %v1656_v60  ;;  %v1682_v4 = vrot.slane %v1674_v33, %v2798_v3  ;;  %v1689_v5 = vrot.slane %v1675_v59, %v2798_v3 }
 0x60e   : > { %v1601_v1 = vpop.f32.mrf.mxu1  ;;  %v2337_v2 = vpop.f32.mrf.mxu0 }
 0x60f   : > { %v1666_v6 = vrot.slane %v1658_v63, %v2798_v3  ;;  %v1673_v9 = vrot.slane %v1659_v0, %v2798_v3  ;;  %v2460_v63 = vld [vmem:[%s3070_s6 + $0x8] sm:$0xff]   ;;  %v2461_v0 = vld [vmem:[%s3070_s6] sm:$0xff]   ;;  %v2462_v1 = vld [vmem:[%s3071_s7 + $0x38] sm:$0xff]  }
 0x610   : > { %v2331_v10 = vpop.f32.mrf.mxu1  ;;  %2347 = vmatpush3.bf16.msra.mxu0 %v2460_v63  ;;  %v2463_v2 = vld [vmem:[%s3071_s7 + $0x30] sm:$0xff]  }
 0x611   : > { %v1690_v11 = vcombine.low %v1666_v6, %v1682_v4  ;;  %v1691_v13 = vcombine.high %v1666_v6, %v1682_v4  ;;  %v1706_v15 = vcombine.low %v1673_v9, %v1689_v5  ;;  %v1707_v16 = vcombine.high %v1673_v9, %v1689_v5  ;;  %2348 = vmatprep.subr.bf16.mxu0 %v2602_v14  ;;  %v2464_v4 = vld [vmem:[%s3071_s7 + $0x28] sm:$0xff]   ;;  %v2465_v5 = vld [vmem:[%s3071_s7 + $0x20] sm:$0xff]   ;;  %v2466_v6 = vld [vmem:[%s3071_s7 + $0x18] sm:$0xff]  }
 0x612   : > { %v2467_v9 = vld [vmem:[%s3071_s7 + $0x10] sm:$0xff]  }
 0x613   : > { %v1698_v18 = vrot.slane %v1690_v11, %v2801_v12  ;;  %v1705_v20 = vrot.slane %v1691_v13, %v2801_v12  ;;  %v1714_v21 = vrot.slane %v1706_v15, %v2801_v12  ;;  %v1721_v22 = vrot.slane %v1707_v16, %v2801_v12 }
 0x614   : > { %2349 = vmatpush3.bf16.msra.mxu0 %v2461_v0  ;;  %v1891_v15 = vsub.s32 3, %v2767_v24  ;;  %v1896_v16 = vsub.s32 4, %v2767_v24 }
 0x615   : > { %v1726_v23 = vcombine.low %v1698_v18, %v1705_v20  ;;  %v2205_v27 = vcombine.high %v1698_v18, %v1705_v20  ;;  %v1742_v25 = vcombine.low %v1714_v21, %v1721_v22  ;;  %v2206_v28 = vcombine.high %v1714_v21, %v1721_v22 }
 0x616   : > { %v1892_v17 = vrot.slane %v2770_v26, %v1891_v15  ;;  %v1897_v21 = vrot.slane %v2770_v26, %v1896_v16 }
 0x617   : > { %v1733_v30 = vrot.slane %v1726_v23, %v2798_v3  ;;  %v1741_v31 = vrot.slane %v2205_v27, %v2798_v3  ;;  %v1749_v32 = vrot.slane %v1742_v25, %v2798_v3  ;;  %v1757_v34 = vrot.slane %v2206_v28, %v2798_v3  ;;  %v2468_v25 = vld [vmem:[%s3071_s7 + $0x8] sm:$0xff]   ;;  %v2469_v28 = vld [vmem:[%s3071_s7] sm:$0xff]  }
 0x619   : > { %v1759_v35 = vcombine.high %v1733_v30, %v1741_v31  ;;  %v1775_v36 = vcombine.high %v1749_v32, %v1757_v34  ;;  %v1758_v37 = vcombine.low %v1733_v30, %v1741_v31  ;;  %v1774_v38 = vcombine.low %v1749_v32, %v1757_v34 }
 0x61b   : > { %v1773_v39 = vrot.slane %v1759_v35, %v2801_v12  ;;  %v1789_v7 = vrot.slane %v1775_v36, %v2801_v12  ;;  %v1766_v8 = vrot.slane %v1758_v37, %v2801_v12  ;;  %v1782_v40 = vrot.slane %v1774_v38, %v2801_v12 }
 0x61d   : > { %v1792_v41 = vcombine.low %v1773_v39, %v1789_v7  ;;  %v1791_v42 = vcombine.high %v1766_v8, %v1782_v40  ;;  %v1790_v43 = vcombine.low %v1766_v8, %v1782_v40  ;;  %v1793_v3 = vcombine.high %v1773_v39, %v1789_v7 }
 0x61f   : > { %1799 = vrot.lane.b32.xlu1 %v1792_v41, %s2611_s12  ;;  %1795 = vrot.lane.b32.xlu0 %v1791_v42, %s2612_s14  ;;  %s321_s14 = sand.u32 1, %s2583_s28   ;;  %s2525_s12 = scalar_lea.vmem %s2524_s11, 256 }
 0x620   : > { %s2079_s30 = scalar_lea.sflag [#allocation5], %s321_s14 }
 0x623   : > { %1803 = vrot.lane.b32.xlu1 %v1793_v3, %s2613_s19  ;;  %s2184_s19 = sshll.u32 %s321_s14, 3 }
 0x624   : > { %s323_s21 = scalar_lea.vmem [#allocation6], %s2184_s19 }
 0x625   : > { %s2093_s16 = sshll.u32 %s323_s21, 4  ;;  %s3019_s16 = int_to_ptr.vmem [resolvable:$true] %s2093_s16 }
 0x626   : > { %s2519_s25 = scalar_lea.vmem %s3019_s16, 128  ;;  %p2526_p0 = scmp.lt.s32.totalorder %s3019_s16, %s2524_s11 }
 0x627   : > { %p2520_p10 = scmp.ne.s32.totalorder %s3019_s16, %s2519_s25  ;;  %p2527_p1 = scmp.lt.s32.totalorder %s2525_s12, %s2519_s25 }
 0x629   : > { %p2521_p11 = pnand %p2520_p10, %p2700_p4  ;;  %p2528_p2 = por %p2527_p1, %p2526_p0 }
 0x62b   : > { %p2522_p13 = pneg %p2521_p11 }
 0x62d   : > { %p2529_p3 = pnand %p2528_p2, %p2522_p13 }
 0x691   : > { %v1800_v44 = vpop.permute.xlu1 %1799  ;;  %v1796_v45 = vpop.permute.xlu0 %1795 }
 0x692   : > { %v1806_v46 = vsel %vm1178_vm4, %v1790_v43, %v1796_v45 }
 0x693   : > { %v1808_v47 = vsel %vm1807_vm5, %v1806_v46, %v1800_v44 }
 0x695   : > { %v1804_v19 = vpop.permute.xlu1 %1803 }
 0x696   : > { %v1810_v12 = vsel %vm1809_vm6, %v1808_v47, %v1804_v19 }
 0x697   : > { %v1811_v48 = vpack.c.bf16 %v1810_v12, %v1810_v12 }
 0x699   : > { %2343 = vmatmul.mubr.msk.bf16.vlgmr.msra.gmra.mxu1 %vm335_vm0, %v1811_v48 }
 0x69a   : > { %2370 = vmatprep.mubr.msk.bf16.mxu1 %vm2603_vm1, %v2602_v14  ;;  %2355 = vmatpush3.bf16.msra.mxu1 %v2462_v1 }
 0x69b   : > { %2356 = vmatprep.subr.bf16.mxu1 %v2602_v14 }
 0x69e   : > { %2357 = vmatpush3.bf16.msra.mxu1 %v2463_v2 }
 0x69f   : > { %2358 = vmatprep.subr.bf16.mxu1 %v2602_v14 }
 0x6a2   : > { %2359 = vmatpush3.bf16.msra.mxu1 %v2464_v4 }
 0x6a3   : > { %2360 = vmatprep.subr.bf16.mxu1 %v2602_v14 }
 0x6a6   : > { %2361 = vmatpush3.bf16.msra.mxu1 %v2465_v5 }
 0x6a7   : > { %2362 = vmatprep.subr.bf16.mxu1 %v2602_v14 }
 0x6aa   : > { %2363 = vmatpush3.bf16.msra.mxu1 %v2466_v6 }
 0x6ab   : > { %2364 = vmatprep.subr.bf16.mxu1 %v2602_v14 }
 0x6ae   : > { %2365 = vmatpush3.bf16.msra.mxu1 %v2467_v9 }
 0x6af   : > { %2366 = vmatprep.subr.bf16.mxu1 %v2602_v14 }
 0x6b2   : > { %2367 = vmatpush3.bf16.msra.mxu1 %v2468_v25 }
 0x6b3   : > { %2368 = vmatprep.subr.bf16.mxu1 %v2602_v14  ;;  %v1986_v14 = vsub.s32 5, %v2767_v24 }
 0x6b5   : > { %v1987_v38 = vrot.slane %v2770_v26, %v1986_v14 }
 0x6b6   : > { %2369 = vmatpush3.bf16.msra.mxu1 %v2469_v28 }
 0x759   : > { %v1869_v51 = vpop.f32.mrf.mxu1 }
 0x75a   : > { %v1870_v52 = vadd.f32 %v1869_v51, %v1819_v50 }
 0x75b   : > { %v2344_v53 = vpop.f32.mrf.mxu1 }
 0x75c   : > { %v2957_v55 = vadd.f32 %v2492_v54, %v1870_v52 }
 0x75d   : > { %v1872_v56 = vpop.f32.mrf.mxu1 }
 0x75e   : > { %v1876_v57 = vsel %vm335_vm0, %v2957_v55, 0.0 }
 0x75f   : > { %1877 = vadd.xlane.f32.xlu0 %v1876_v57  ;;  %v2345_v58 = vpop.f32.mrf.mxu1 }
 0x7e8   : > { %v1878_v33 = vpop.xlane.xlu0 %1877 }
 0x7e9   : > { %v1879_v59 = vmul.f32 0.03125, %v1878_v33 }
 0x7eb   : > { %v1880_v60 = vsub.f32 %v2957_v55, %v1879_v59 }
 0x7ed   : > { %v1881_v61 = vmul.f32 %v1880_v60, %v1880_v60 }
 0x7ef   : > { %v1882_v62 = vsel %vm335_vm0, %v1881_v61, 0.0 }
 0x7f0   : > { %1883 = vadd.xlane.f32.xlu1 %v1882_v62 }
 0x879   : > { %v1884_v10 = vpop.xlane.xlu1 %1883 }
 0x87a   : > { %v1885_v11 = vmul.f32 0.03125, %v1884_v10 }
 0x87c   : > { %v1886_v13 = vadd.f32 1e-05, %v1885_v11 }
 0x87e   : > { %2490 = vrsqrt.f32 %v1886_v13 }
 0x88b   : > { %v2491_v18 = vpop.eup %2490 }
 0x88c   : > { %v1888_v20 = vmul.f32 %v2491_v18, %v1880_v60 }
 0x88e   : > { %v1893_v22 = vmul.f32 %v1892_v17, %v1888_v20 }
 0x890   : > { %v1898_v23 = vadd.f32 %v1897_v21, %v1893_v22 }
 0x892   : > { %v1899_v27 = vpack.c.bf16 %v1898_v23, %v1898_v23 }
 0x894   : > { %2351 = vmatmul.mubr.msk.bf16.vlgmr.msra.gmra.mxu0 %vm335_vm0, %v1899_v27 }
 0x954   : > { %v1960_v30 = vpop.f32.mrf.mxu0 }
 0x955   : > { %v1961_v31 = vadd.f32 %v2210_v29, %v1960_v30 }
 0x956   : > { %v2352_v32 = vpop.f32.mrf.mxu0 }
 0x957   : > { %v1966_v34 = vmax.f32 %v1961_v31, 0.0 }
 0x958   : > { %v1963_v35 = vpop.f32.mrf.mxu0 }
 0x959   : > { %v1967_v36 = vpack.c.bf16 %v1966_v34, %v1966_v34 }
 0x95a   : > { %v2353_v37 = vpop.f32.mrf.mxu0 }
 0x95b   : > { %2371 = vmatmul.mubr.bf16.vlgmr.msra.gmra.mxu1 %v1967_v36 }
 0xa1b   : > { %v2070_v39 = vpop.f32.mrf.mxu1 }
 0xa1c   : > { %v2071_v7 = vadd.f32 %v2070_v39, %v1987_v38 }
 0xa1d   : > { %v2372_v8 = vpop.f32.mrf.mxu1 }
 0xa1e   : > { %v2076_v40 = vadd.f32 %v2071_v7, %v2957_v55 }
 0xa1f   : > { %v2073_v24 = vpop.f32.mrf.mxu1 }
 0xa20   : > { %2077 = vst.msk [vmem:[%s323_s21] sm:$0xff] %vm335_vm0, %v2076_v40 }
 0xa21   : > { %v2373_v26 = vpop.f32.mrf.mxu1 }
 0xa22   : > { %2532 = shalt.err (!%p2529_p3)
}
 0xa23   : > { %s2533_s19 = scalar_lea.hbm %s3017_s24, 128  ;;  %s2537_s21 = scalar_lea.hbm %s3072_s8, 256 }
 0xa24   : > { %p2534_p5 = scmp.ne.s32.totalorder %s3017_s24, %s2533_s19  ;;  %p2538_p9 = scmp.lt.s32.totalorder %s3017_s24, %s3072_s8 }
 0xa25   : > { %p2539_p12 = scmp.lt.s32.totalorder %s2537_s21, %s2533_s19 }
 0xa26   : > { %p2535_p6 = pnand %p2534_p5, %p2700_p4 }
 0xa27   : > { %p2540_p10 = por %p2539_p12, %p2538_p9 }
 0xa28   : > { %p2536_p7 = pneg %p2535_p6 }
 0xa2a   : > { %p2541_p11 = pnand %p2540_p10, %p2536_p7 }
 0xa2c   : > { %2544 = shalt.err (!%p2541_p11)
}
 0xa2d   : > { %2378 = dma.vmem_to_hbm [thread:$0]  (%p2700_p4), %s3019_s16, 128, %s3017_s24, %s2079_s30  }
 0xa2e PF: > { %p2390_p13 = scmp.ge.s32.totalorder %s2599_s10, 2  ;;  %s2105_s25 = sand.u32 1, %s2579_s27  }
 0xa2f   : > { %s2106_s26 = scalar_lea.sflag [#allocation5], %s2105_s25 }
 0xa30   : > { %p2385_p0 = pnand %p2390_p13, %p2707_p8 }
 0xa32   : > { %p2386_p1 = pneg %p2385_p0 }
 0xa34   : > { %2574 = dma.done.wait (%p2386_p1), %s2106_s26, 128  }
 0xa35   : > { %2576 = vsyncadd (%p2386_p1), %s2106_s26, 4294967168  ;;  %s22_s10 = sadd.s32 1, %s2599_s10   ;;  %s3077_s27 = smov %s2583_s28 }
 0xa36   : > { %p19_p2 = scmp.ge.s32.totalorder %s22_s10, 4   ;;  %s3078_s28 = smov %s2587_s29 }
 0xa37   : > { %s3079_s29 = smov %s2713_s18  ;;  %s3080_s30 = smov %s2595_s9 }
 0xa38   : > { %s3081_s9 = smov %s3083_s13  ;;  %21 = sbr.rel (!%p19_p2) target bundleno = 5 (0x5), region = 99 }
 0xa3d   :  { %2111 = vsyncpa [#allocation4], 1 }
 0xa3e   :  { %2113 = vsyncpa [#allocation4 + $0x1], 1 }
 0xa3f   :  { %2114 = vsyncpa [#allocation5], 1 }
 0xa40   :  { %2116 = vsyncpa [#allocation5 + $0x1], 1 }

// kernel: tpu_custom_call.1
= control target key start
LH: loop header
LB: loop body
LE: loop exit
PB: predicated region body
PF: predicated region fallthrough
CT: control target
= control target key end

     0   :  { %13 = vsyncpa [#allocation4], 0  ;;  %s3062_s0 = inlined_call_operand.vmem [shape: f32[2,8,32], index: 0, kind: input, shape index: {}]   ;;  %s3063_s1 = inlined_call_operand.hbm [shape: f32[6,32], index: 1, kind: input, shape index: {}]   ;;  %s3064_s2 = inlined_call_operand.vmem [shape: f32[1,128], index: 2, kind: input, shape index: {}]   ;;  %s3065_s3 = inlined_call_operand.vmem [shape: bf16[32,32], index: 3, kind: input, shape index: {}]   ;;  %s3066_s4 = inlined_call_operand.vmem [shape: bf16[32,64], index: 4, kind: input, shape index: {}]   ;;  %s3067_s5 = inlined_call_operand.vmem [shape: bf16[32,32], index: 5, kind: input, shape index: {}]   ;;  %s3068_s6 = inlined_call_operand.vmem [shape: bf16[32,128], index: 6, kind: input, shape index: {}]   ;;  %s3069_s7 = inlined_call_operand.vmem [shape: bf16[128,32], index: 7, kind: input, shape index: {}]   ;;  %s3070_s8 = inlined_call_operand.hbm [shape: f32[2,8,32], index: 8, kind: output, shape index: {}]  }
   0x1   :  { %14 = vsyncpa [#allocation5], 0 }
   0x2   :  { %16 = vsyncpa [#allocation5 + $0x1], 0  ;;  %s2658_s27 = smov 0   ;;  %s2660_s28 = smov 0  }
   0x3   :  { %s2662_s29 = smov 0   ;;  %s2664_s30 = smov 0  }
   0x4   :  { %s2666_s9 = smov 0   ;;  %s2668_s10 = smov 0  }
   0x5 LB: > { %s2175_s11 = sadd.s32 4294967295, %s2597_s10   ;;  %s2176_s12 = sadd.s32 4294967294, %s2597_s10   ;;  %s2597_s10 = sphi %s2668_s10, %s22_s10   ;;  %s2593_s9 = sphi %s2666_s9, %s3079_s9   ;;  %s2589_s30 = sphi %s2664_s30, %s3078_s30   ;;  %s2585_s29 = sphi %s2662_s29, %s3077_s29   ;;  %s2581_s28 = sphi %s2660_s28, %s3076_s28   ;;  %s2577_s27 = sphi %s2658_s27, %s3075_s27  }
   0x6   : > { %s34_s13 = sadd.s32 1, %s2593_s9  ;;  %s216_s14 = sadd.s32 1, %s2585_s29 }
   0x7   : > { %p36_p0 = scmp.ge.s32.totalorder %s34_s13, 2  ;;  %p226_p1 = scmp.ne.s32.totalorder %s2585_s29, %s2581_s28 }
   0x8   : > { %p227_p2 = scmp.eq.s32.totalorder %s2175_s11, 1  ;;  %p232_p3 = scmp.ne.s32.totalorder %s2581_s28, %s2577_s27 }
   0x9   : > { %s3081_s13 = smov (%p36_p0, %s34_s13), 0  ;;  %p233_p5 = scmp.eq.s32.totalorder %s2176_s12, 1 }
   0xa   : > { %p2698_p4 = por %p227_p2, %p226_p1  ;;  %s211_s16 = ssub.s32 %s2593_s9, %s3081_s13 }
   0xb   : > { %p2177_p6 = scmp.ge.s32.totalorder %s2597_s10, 1  ;;  %p214_p7 = scmp.eq.s32.totalorder %s211_s16, 0 }
   0xc   : > { %p2705_p8 = por %p233_p5, %p232_p3  ;;  %p240_p9 = scmp.lt.s32.totalorder %s2597_s10, 3 }
   0xd   : > { %s2711_s18 = scalar_select %p214_p7, %s2585_s29, %s216_s14  }
   0xe   : > { %p2713_p10 = pnand %p2177_p6, %p240_p9  ;;  %p2717_p11 = scmp.eq.s32.totalorder %s2175_s11, 0 }
   0xf   : > { %s2599_s21 = smov [#allocation3]  }
  0x10   : > { %p2378_p12 = pneg %p2713_p10  ;;  %s253_s22 = sshll.u32 %s2599_s21, 4  ;;  %s254_s22 = int_to_ptr.vmem [resolvable:$true] %s253_s22 }
  0x11   : > { %s2502_s23 = scalar_lea.vmem %s254_s22, 128  ;;  %p2510_p5 = scmp.lt.s32.totalorder %s254_s22, %s254_s22 }
  0x12   : > { %p2379_p13 = pnand %p2717_p11, %p2378_p12  ;;  %p2503_p1 = scmp.ne.s32.totalorder %s254_s22, %s2502_s23 }
  0x13   : > { %p2511_p6 = scmp.lt.s32.totalorder %s2502_s23, %s2502_s23 }
  0x14   : > { %p2493_p0 = pneg %p2379_p13 }
  0x15   : > { %p2512_p7 = por %p2511_p6, %p2510_p5 }
  0x16   : > { %p2505_p2 = pnand %p2503_p1, %p2493_p0 }
  0x18   : > { %p2506_p3 = pneg %p2505_p2 }
  0x1a   : > { %p2513_p9 = pnand %p2512_p7, %p2506_p3 }
  0x1c   : > { %2516 = shalt.err (!%p2513_p9)
}
  0x1d   : > { %2381 = dma.hbm_to_vmem [thread:$0]  (!%p2379_p13), %s3063_s1, 128, %s254_s22, [#allocation4]  }
  0x1e   : > { %291 = sbr.rel (%p2713_p10) target bundleno = 2606 (0xa2e), region = 52 }
  0x23   : > { %2568 = dma.done.wait (%p2717_p11), [#allocation4], 128  }
  0x24   : > { %2570 = vsyncadd (%p2717_p11), [#allocation4], 4294967168  ;;  %p324_p12 = scmp.lt.s32.totalorder %s2589_s30, 1  ;;  %vm335_vm0 = vcmask 261120   ;;  %v2451_v12 = vld [vmem:[%s3066_s4] sm:$0xff]   ;;  %v2452_v13 = vld [vmem:[%s3066_s4 + $0x8] sm:$0xff]   ;;  %v350_v22 = vlaneseq }
  0x25   : > { %v2600_v14 = vmov 0.0   ;;  %vm2601_vm1 = vmmov 0   ;;  %v2453_v15 = vld [vmem:[%s3066_s4] sm:$0xff]   ;;  %s2602_s25 = smov 96   ;;  %v2450_v16 = vld [vmem:[%s3066_s4 + $0x8] sm:$0xff]   ;;  %vm421_vm2 = vcmask 257024  }
  0x26   : > { %s325_s26 = scalar_select %p324_p12, %s2589_s30, 1  ;;  %2264 = vmatprep.subr.bf16.mxu0 %v2600_v14  ;;  %2268 = vmatprep.mubr.msk.bf16.mxu0 %vm2601_vm1, %v2600_v14  ;;  %v2765_v24 = vshrl.u32 %v350_v22, 7  ;;  %v2768_v26 = vld [vmem:[#allocation3] sm:$0x3f]  ;;  %v2455_v42 = vld [vmem:[%s3065_s3] sm:$0xff]   ;;  %vm1182_vm3 = vcmask 1043456  }
  0x27   : > { %2265 = vmatpush3.bf16.msra.mxu0 %v2452_v13  ;;  %2288 = vmatprep.subr.bf16.mxu1 %v2600_v14  ;;  %v2454_v40 = vld [vmem:[%s3065_s3 + $0x8] sm:$0xff]   ;;  %s2603_s21 = smov 104   ;;  %s2604_s22 = smov 120   ;;  %v2606_v59 = vmov 1983009808   ;;  %vm1178_vm4 = vcmask 64512  }
  0x28   : > { %s2183_s11 = sshll.u32 %s325_s26, 3  ;;  %2266 = vmatprep.subr.bf16.mxu0 %v2600_v14  ;;  %2290 = vmatprep.mubr.msk.bf16.mxu1 %vm2601_vm1, %v2600_v14  ;;  %v352_v25 = vsub.s32 0, %v2765_v24  ;;  %v357_v27 = vsub.s32 1, %v2765_v24  ;;  %s2605_s23 = smov 112   ;;  %v605_v60 = vunpack.c.l.s4 %v2606_v59  ;;  %v2607_v62 = vmov 1934713408  }
  0x29   : > { %s2739_s16 = scalar_lea.vmem %s3062_s0, %s2183_s11  ;;  %v622_v63 = vunpack.c.l.s4 %v2607_v62  ;;  %s2609_s12 = smov 16   ;;  %vm1807_vm5 = vcmask 130048   ;;  %vm1809_vm6 = vcmask 195584  }
  0x2a   : > { %v334_v0 = vld [vmem:[%s2739_s16] sm:$0xff]  ;;  %v353_v28 = vrot.slane %v2768_v26, %v352_v25  ;;  %v358_v31 = vrot.slane %v2768_v26, %v357_v27  ;;  %v606_v61 = vunpack.c.0.s8 %v605_v60  ;;  %v2608_v27 = vmov 0   ;;  %s2610_s14 = smov 8   ;;  %s2611_s19 = smov 24  }
  0x2b   : > { %v336_v1 = vsel %vm335_vm0, %v334_v0, 0.0  ;;  %2267 = vmatpush3.bf16.msra.mxu0 %v2453_v15  ;;  %s2221_s20 = sshll.u32 %s2589_s30, 7  ;;  %s2612_s26 = smov [#allocation6]  }
  0x2c   : > { %337 = vadd.xlane.f32.xlu0 %v336_v1  ;;  %491 = vadd.xlane.f32.xlu1 %v336_v1  ;;  %s3015_s24 = scalar_lea.hbm %s3070_s8, %s2221_s20  ;;  %s2521_s11 = sshll.u32 %s2612_s26, 4  ;;  %s2522_s11 = int_to_ptr.vmem [resolvable:$false] %s2521_s11 }
  0x2d   : > { %2272 = vmatprep.subr.bf16.mxu0 %v2600_v14 }
  0xb5   : > { %v338_v2 = vpop.xlane.xlu0 %337  ;;  %v492_v3 = vpop.xlane.xlu1 %491 }
  0xb6   : > { %v340_v4 = vmul.f32 0.03125, %v338_v2  ;;  %v494_v5 = vmul.f32 0.03125, %v492_v3  ;;  %v2796_v3 = vsub.s32 %v606_v61, %v2765_v24 }
  0xb8   : > { %v341_v6 = vsub.f32 %v334_v0, %v340_v4  ;;  %v495_v7 = vsub.f32 %v334_v0, %v494_v5  ;;  %v623_v4 = vunpack.c.0.s8 %v622_v63 }
  0xba   : > { %v342_v8 = vmul.f32 %v341_v6, %v341_v6  ;;  %v496_v9 = vmul.f32 %v495_v7, %v495_v7 }
  0xbc   : > { %v343_v10 = vsel %vm335_vm0, %v342_v8, 0.0  ;;  %v497_v11 = vsel %vm335_vm0, %v496_v9, 0.0 }
  0xbd   : > { %344 = vadd.xlane.f32.xlu0 %v343_v10  ;;  %498 = vadd.xlane.f32.xlu1 %v497_v11 }
  0xce   : > { %437 = vrot.lane.b32.xlu1 %v2451_v12, %s2602_s25  ;;  %v2799_v12 = vsub.s32 %v623_v4, %v2765_v24 }
  0xd3   : > { %439 = vrot.lane.b32.xlu0 %v2450_v16, %s2602_s25 }
 0x146   : > { %v345_v17 = vpop.xlane.xlu0 %344  ;;  %v499_v19 = vpop.xlane.xlu1 %498 }
 0x147   : > { %v346_v18 = vmul.f32 0.03125, %v345_v17  ;;  %v500_v21 = vmul.f32 0.03125, %v499_v19 }
 0x149   : > { %v347_v20 = vadd.f32 1e-05, %v346_v18  ;;  %v501_v23 = vadd.f32 1e-05, %v500_v21 }
 0x14a   : > { %v440_v35 = vpop.permute.xlu0 %439  ;;  %v438_v38 = vpop.permute.xlu1 %437 }
 0x14b   : > { %2468 = vrsqrt.f32 %v347_v20 }
 0x14c   : > { %2470 = vrsqrt.f32 %v501_v23 }
 0x158   : > { %v2469_v29 = vpop.eup %2468 }
 0x159   : > { %v349_v30 = vmul.f32 %v2469_v29, %v341_v6  ;;  %v2471_v34 = vpop.eup %2470 }
 0x15a   : > { %v503_v37 = vmul.f32 %v2471_v34, %v495_v7 }
 0x15b   : > { %v354_v32 = vmul.f32 %v353_v28, %v349_v30 }
 0x15c   : > { %v508_v39 = vmul.f32 %v503_v37, %v353_v28 }
 0x15d   : > { %v359_v33 = vadd.f32 %v358_v31, %v354_v32 }
 0x15e   : > { %v513_v41 = vadd.f32 %v508_v39, %v358_v31 }
 0x15f   : > { %v360_v36 = vpack.c.bf16 %v359_v33, %v359_v33 }
 0x160   : > { %v514_v43 = vpack.c.bf16 %v513_v41, %v513_v41 }
 0x161   : > { %2269 = vmatmul.mubr.msk.bf16.vlgmr.msra.gmra.mxu0 %vm335_vm0, %v360_v36 }
 0x162   : > { %2273 = vmatpush3.bf16.msra.mxu0 %v440_v35  ;;  %2276 = vmatprep.mubr.msk.bf16.mxu0 %vm2601_vm1, %v2600_v14 }
 0x163   : > { %2274 = vmatprep.subr.bf16.mxu0 %v2600_v14 }
 0x166   : > { %2275 = vmatpush3.bf16.msra.mxu0 %v438_v38 }
 0x167   : > { %2280 = vmatprep.subr.bf16.mxu0 %v2600_v14 }
 0x169   : > { %2277 = vmatmul.mubr.msk.bf16.vlgmr.msra.gmra.mxu0 %vm335_vm0, %v360_v36 }
 0x16a   : > { %2281 = vmatpush3.bf16.msra.mxu0 %v2454_v40  ;;  %2284 = vmatprep.mubr.msk.bf16.mxu0 %vm2601_vm1, %v2600_v14 }
 0x16b   : > { %2282 = vmatprep.subr.bf16.mxu0 %v2600_v14 }
 0x16e   : > { %2283 = vmatpush3.bf16.msra.mxu0 %v2455_v42 }
 0x16f   : > { %2294 = vmatprep.subr.bf16.mxu0 %v2600_v14 }
 0x171   : > { %2285 = vmatmul.mubr.msk.bf16.vlgmr.msra.gmra.mxu0 %vm335_vm0, %v514_v43 }
 0x172   : > { %2296 = vmatprep.mubr.msk.bf16.mxu0 %vm2601_vm1, %v2600_v14 }
 0x221   : > { %v414_v44 = vpop.f32.mrf.mxu0 }
 0x222   : > { %v420_v45 = vpack.c.bf16 %v414_v44, %v414_v44 }
 0x223   : > { %v2270_v46 = vpop.f32.mrf.mxu0 }
 0x224   : > { %422 = vst.msk [vmem:[#allocation2] sm:$0xf] %vm421_vm2, %v420_v45 }
 0x225   : > { %v417_v47 = vpop.f32.mrf.mxu0 }
 0x227   : > { %v2271_v48 = vpop.f32.mrf.mxu0 }
 0x229   : > { %v477_v49 = vpop.f32.mrf.mxu0 }
 0x22a   : > { %v483_v50 = vpack.c.bf16 %v477_v49, %v477_v49 }
 0x22b   : > { %v2278_v51 = vpop.f32.mrf.mxu0  ;;  %v583_v52 = vld [vmem:[#allocation2] sm:$0xf] }
 0x22c   : > { %485 = vst.msk [vmem:[#allocation2 + $0x4] sm:$0xf] %vm421_vm2, %v483_v50  ;;  %589 = vrot.lane.b32.xlu0 %v583_v52, %s2603_s21  ;;  %585 = vrot.lane.b32.xlu1 %v583_v52, %s2604_s22  ;;  %v594_v6 = vshrl.u32 %v583_v52, 16 }
 0x22d   : > { %v480_v53 = vpop.f32.mrf.mxu0 }
 0x22f   : > { %v2279_v54 = vpop.f32.mrf.mxu0 }
 0x230   : > { %587 = vrot.lane.b32.xlu1 %v583_v52, %s2605_s23 }
 0x231   : > { %v568_v55 = vpop.f32.mrf.mxu0 }
 0x232   : > { %v574_v30 = vmul.f32 0.35355338, %v568_v55 }
 0x233   : > { %v2286_v56 = vpop.f32.mrf.mxu0 }
 0x234   : > { %v2811_v33 = vpack.c.bf16 %v574_v30, %v574_v30 }
 0x235   : > { %v571_v57 = vpop.f32.mrf.mxu0 }
 0x237   : > { %v2287_v58 = vpop.f32.mrf.mxu0 }
 0x29e   : > { %v586_v0 = vpop.permute.xlu1 %585  ;;  %v590_v2 = vpop.permute.xlu0 %589 }
 0x29f   : > { %v595_v1 = vshrl.u32 %v586_v0, 16  ;;  %v593_v5 = vpack.i.b16 %v586_v0, %v583_v52  ;;  %v601_v8 = vshrl.u32 %v590_v2, 16 }
 0x2a1   : > { %v596_v9 = vpack.i.b16 %v595_v1, %v594_v6  ;;  %v610_v13 = vrot.slane %v593_v5, %v2796_v3 }
 0x2a2   : > { %v588_v7 = vpop.permute.xlu1 %587 }
 0x2a3   : > { %v599_v10 = vpack.i.b16 %v590_v2, %v588_v7  ;;  %v600_v11 = vshrl.u32 %v588_v7, 16  ;;  %v644_v18 = vrot.slane %v596_v9, %v2796_v3 }
 0x2a5   : > { %v602_v15 = vpack.i.b16 %v601_v8, %v600_v11  ;;  %v618_v16 = vrot.slane %v599_v10, %v2796_v3 }
 0x2a7   : > { %v619_v17 = vcombine.low %v610_v13, %v618_v16  ;;  %v652_v19 = vrot.slane %v602_v15, %v2796_v3  ;;  %v620_v22 = vcombine.high %v610_v13, %v618_v16 }
 0x2a9   : > { %v627_v20 = vrot.slane %v619_v17, %v2799_v12  ;;  %v653_v21 = vcombine.low %v644_v18, %v652_v19  ;;  %v634_v25 = vrot.slane %v620_v22, %v2799_v12  ;;  %v654_v29 = vcombine.high %v644_v18, %v652_v19  ;;  %v2833_v19 = vld [vmem:[#allocation2 + $0x4] sm:$0xf] }
 0x2ab   : > { %760 = vxpose.xlu1.c.b16.start.end [1/1] (short) (narrow) %v627_v20, 16  ;;  %v661_v23 = vrot.slane %v653_v21, %v2799_v12  ;;  %v635_v28 = vcombine.high %v627_v20, %v2608_v27  ;;  %v636_v31 = vcombine.high %v634_v25, %v2608_v27  ;;  %v668_v32 = vrot.slane %v654_v29, %v2799_v12 }
 0x2ad   : > { %776 = vxpose.xlu0.c.b16.start.end [1/1] (short) (narrow) %v661_v23, 16  ;;  %v669_v34 = vcombine.high %v661_v23, %v2608_v27  ;;  %v670_v35 = vcombine.high %v668_v32, %v2608_v27 }
 0x2af   : > { %824 = vxpose.xlu1.c.b16.start.end [1/1] (short) (narrow) %v634_v25, 16 }
 0x2b1   : > { %792 = vxpose.xlu0.c.b16.start.end [1/1] (short) (narrow) %v635_v28, 16 }
 0x2b3   : > { %856 = vxpose.xlu1.c.b16.start.end [1/1] (short) (narrow) %v636_v31, 16 }
 0x2b5   : > { %840 = vxpose.xlu0.c.b16.start.end [1/1] (short) (narrow) %v668_v32, 16 }
 0x2b7   : > { %577 = vrot.lane.b32.xlu1 %v2811_v33, %s2604_s22 }
 0x2b9   : > { %808 = vxpose.xlu0.c.b16.start.end [1/1] (short) (narrow) %v669_v34, 16 }
 0x2bd   : > { %872 = vxpose.xlu0.c.b16.start.end [1/1] (short) (narrow) %v670_v35, 16 }
 0x30d   : > { %v768_v36 = vpop.trf.xlu1 }
 0x30f   : > { %v784_v37 = vpop.trf.xlu0 }
 0x311   : > { %v832_v38 = vpop.trf.xlu1 }
 0x312   : > { %v888_v42 = vcombine.low %v768_v36, %v832_v38 }
 0x313   : > { %v800_v39 = vpop.trf.xlu0 }
 0x314   : > { %v895_v45 = vrot.slane %v888_v42, %v2796_v3 }
 0x315   : > { %v864_v40 = vpop.trf.xlu1 }
 0x316   : > { %v896_v43 = vcombine.low %v800_v39, %v864_v40 }
 0x317   : > { %v848_v41 = vpop.trf.xlu0 }
 0x318   : > { %v903_v46 = vrot.slane %v896_v43, %v2796_v3  ;;  %v922_v47 = vcombine.low %v784_v37, %v848_v41 }
 0x31a   : > { %v904_v49 = vcombine.low %v895_v45, %v903_v46  ;;  %v929_v51 = vrot.slane %v922_v47, %v2796_v3  ;;  %v905_v56 = vcombine.high %v895_v45, %v903_v46 }
 0x31b   : > { %v816_v44 = vpop.trf.xlu0 }
 0x31c   : > { %v912_v55 = vrot.slane %v904_v49, %v2799_v12  ;;  %v919_v63 = vrot.slane %v905_v56, %v2799_v12 }
 0x31e   : > { %v960_v59 = vshrl.u32 %v912_v55, 16  ;;  %v920_v2 = vcombine.high %v912_v55, %v2608_v27  ;;  %v976_v6 = vshrl.u32 %v919_v63, 16  ;;  %v921_v9 = vcombine.high %v919_v63, %v2608_v27 }
 0x31f   : > { %v880_v48 = vpop.trf.xlu0 }
 0x320   : > { %v930_v50 = vcombine.low %v816_v44, %v880_v48  ;;  %v968_v13 = vshrl.u32 %v920_v2, 16  ;;  %v984_v17 = vshrl.u32 %v921_v9, 16 }
 0x322   : > { %v937_v52 = vrot.slane %v930_v50, %v2796_v3 }
 0x324   : > { %v938_v53 = vcombine.low %v929_v51, %v937_v52  ;;  %v939_v54 = vcombine.high %v929_v51, %v937_v52 }
 0x326   : > { %v946_v57 = vrot.slane %v938_v53, %v2799_v12  ;;  %v953_v61 = vrot.slane %v939_v54, %v2799_v12 }
 0x328   : > { %v958_v58 = vpack.i.b16 %v946_v57, %v912_v55  ;;  %v961_v60 = vshrl.u32 %v946_v57, 16  ;;  %v974_v0 = vpack.i.b16 %v953_v61, %v919_v63  ;;  %v954_v1 = vcombine.high %v946_v57, %v2608_v27 }
 0x329   : > { %v977_v5 = vshrl.u32 %v953_v61, 16  ;;  %v955_v8 = vcombine.high %v953_v61, %v2608_v27  ;;  %v578_v25 = vpop.permute.xlu1 %577 }
 0x32a   : > { %988 = vxpose.xlu0.c.b16.start.end [1/1] (short) (narrow) %v958_v58, 16  ;;  %v962_v62 = vpack.i.b16 %v961_v60, %v960_v59  ;;  %v966_v4 = vpack.i.b16 %v954_v1, %v920_v2  ;;  %v969_v11 = vshrl.u32 %v954_v1, 16 }
 0x32b   : > { %v978_v7 = vpack.i.b16 %v977_v5, %v976_v6  ;;  %v982_v10 = vpack.i.b16 %v955_v8, %v921_v9  ;;  %v985_v16 = vshrl.u32 %v955_v8, 16 }
 0x32c   : > { %1004 = vxpose.xlu1.c.b16.start.end [1/1] (short) (narrow) %v962_v62, 16  ;;  %v970_v15 = vpack.i.b16 %v969_v11, %v968_v13 }
 0x32d   : > { %v986_v18 = vpack.i.b16 %v985_v16, %v984_v17 }
 0x32e   : > { %1052 = vxpose.xlu0.c.b16.start.end [1/1] (short) (narrow) %v974_v0, 16 }
 0x330   : > { %581 = vrot.lane.b32.xlu1 %v2811_v33, %s2603_s21 }
 0x332   : > { %1020 = vxpose.xlu0.c.b16.start.end [1/1] (short) (narrow) %v966_v4, 16 }
 0x336   : > { %1068 = vxpose.xlu0.c.b16.start.end [1/1] (short) (narrow) %v978_v7, 16 }
 0x33a   : > { %1084 = vxpose.xlu0.c.b16.start.end [1/1] (short) (narrow) %v982_v10, 16 }
 0x33e   : > { %1036 = vxpose.xlu0.c.b16.start.end [1/1] (short) (narrow) %v970_v15, 16 }
 0x342   : > { %1100 = vxpose.xlu0.c.b16.start.end [1/1] (short) (narrow) %v986_v18, 16 }
 0x34b   : > { %579 = vrot.lane.b32.xlu0 %v2811_v33, %s2605_s23 }
 0x34f   : > { %674 = vrot.lane.b32.xlu0 %v2833_v19, %s2604_s22 }
 0x38c   : > { %v996_v20 = vpop.trf.xlu0 }
 0x38e   : > { %v1012_v34 = vpop.trf.xlu1 }
 0x390   : > { %v1060_v21 = vpop.trf.xlu0 }
 0x391   : > { %v1116_v28 = vcombine.low %v996_v20, %v1060_v21 }
 0x393   : > { %v1123_v32 = vrot.slane %v1116_v28, %v2796_v3 }
 0x394   : > { %v1028_v22 = vpop.trf.xlu0 }
 0x398   : > { %v1076_v23 = vpop.trf.xlu0 }
 0x399   : > { %v1141_v37 = vcombine.low %v1012_v34, %v1076_v23 }
 0x39b   : > { %v1148_v41 = vrot.slane %v1141_v37, %v2796_v3 }
 0x39c   : > { %v1092_v29 = vpop.trf.xlu0 }
 0x39d   : > { %v1124_v30 = vcombine.low %v1028_v22, %v1092_v29 }
 0x39f   : > { %v1131_v31 = vrot.slane %v1124_v30, %v2796_v3  ;;  %v683_v30 = vshrl.u32 %v2833_v19, 16 }
 0x3a0   : > { %v1044_v35 = vpop.trf.xlu0 }
 0x3a1   : > { %v1132_v36 = vcombine.low %v1123_v32, %v1131_v31 }
 0x3a3   : > { %v1139_v40 = vrot.slane %v1132_v36, %v2799_v12 }
 0x3a4   : > { %v1108_v38 = vpop.trf.xlu0 }
 0x3a5   : > { %v1149_v39 = vcombine.low %v1044_v35, %v1108_v38  ;;  %v1140_v44 = vcombine.high %v1139_v40, %v2608_v27  ;;  %v1169_v47 = vshrl.u32 %v1139_v40, 16 }
 0x3a7   : > { %v1156_v42 = vrot.slane %v1149_v39, %v2796_v3  ;;  %v1175_v50 = vshrl.u32 %v1140_v44, 16 }
 0x3a9   : > { %v1157_v43 = vcombine.low %v1148_v41, %v1156_v42 }
 0x3ab   : > { %v1164_v45 = vrot.slane %v1157_v43, %v2799_v12 }
 0x3ad   : > { %v1168_v46 = vpack.i.b16 %v1164_v45, %v1139_v40  ;;  %v1170_v48 = vshrl.u32 %v1164_v45, 16  ;;  %v1165_v49 = vcombine.high %v1164_v45, %v2608_v27 }
 0x3af   : > { %v1184_v51 = vsel %vm1182_vm3, %v1168_v46, 0  ;;  %v1171_v52 = vpack.i.b16 %v1170_v48, %v1169_v47  ;;  %v1174_v53 = vpack.i.b16 %v1165_v49, %v1140_v44  ;;  %v1176_v54 = vshrl.u32 %v1165_v49, 16 }
 0x3b0   : > { %2289 = vmatpush3.bf16.msra.mxu1 %v1184_v51 }
 0x3b1   : > { %v1230_v55 = vsel %vm1182_vm3, %v1171_v52, 0  ;;  %2300 = vmatprep.subr.bf16.mxu1 %v2600_v14  ;;  %v1177_v56 = vpack.i.b16 %v1176_v54, %v1175_v50  ;;  %v1276_v57 = vsel %vm1182_vm3, %v1174_v53, 0 }
 0x3b2   : > { %2295 = vmatpush3.bf16.msra.mxu0 %v1230_v55 }
 0x3b3   : > { %2291 = vmatmul.mubr.msk.bf16.vlgmr.msra.gmra.mxu1 %vm1178_vm4, %v2811_v33  ;;  %2306 = vmatprep.subr.bf16.mxu0 %v2600_v14  ;;  %v1322_v58 = vsel %vm1182_vm3, %v1177_v56, 0  ;;  %v582_v33 = vpop.permute.xlu1 %581 }
 0x3b4   : > { %2301 = vmatpush3.bf16.msra.mxu1 %v1276_v57  ;;  %2302 = vmatprep.mubr.msk.bf16.mxu1 %vm2601_vm1, %v2600_v14 }
 0x3b5   : > { %2297 = vmatmul.mubr.msk.bf16.vlgmr.msra.gmra.mxu0 %vm1178_vm4, %v578_v25  ;;  %2312 = vmatprep.subr.bf16.mxu1 %v2600_v14 }
 0x3b6   : > { %2307 = vmatpush3.bf16.msra.mxu0 %v1322_v58  ;;  %2308 = vmatprep.mubr.msk.bf16.mxu0 %vm2601_vm1, %v2600_v14 }
 0x3b7   : > { %2318 = vmatprep.subr.bf16.mxu0 %v2600_v14 }
 0x3bd   : > { %v580_v59 = vpop.permute.xlu0 %579  ;;  %2309 = vmatmul.mubr.msk.bf16.vlgmr.msra.gmra.mxu0 %vm1178_vm4, %v582_v33 }
 0x3be   : > { %2303 = vmatmul.mubr.msk.bf16.vlgmr.msra.gmra.mxu1 %vm1178_vm4, %v580_v59  ;;  %2320 = vmatprep.mubr.msk.bf16.mxu0 %vm2601_vm1, %v2600_v14 }
 0x3bf   : > { %2314 = vmatprep.mubr.msk.bf16.mxu1 %vm2601_vm1, %v2600_v14 }
 0x3c1   : > { %v675_v20 = vpop.permute.xlu0 %674 }
 0x3c2   : > { %v684_v23 = vshrl.u32 %v675_v20, 16  ;;  %v682_v32 = vpack.i.b16 %v675_v20, %v2833_v19 }
 0x3c4   : > { %v685_v35 = vpack.i.b16 %v684_v23, %v683_v30  ;;  %v699_v40 = vrot.slane %v682_v32, %v2796_v3 }
 0x3c6   : > { %v733_v43 = vrot.slane %v685_v35, %v2796_v3 }
 0x473   : > { %v1220_v60 = vpop.f32.mrf.mxu1 }
 0x474   : > { %v1364_v61 = vsel %vm1178_vm4, %v1220_v60, -inf }
 0x475   : > { %1365 = vmax.xlane.f32.xlu0 %v1364_v61  ;;  %v2292_v62 = vpop.f32.mrf.mxu1  ;;  %v1266_v63 = vpop.f32.mrf.mxu0 }
 0x476   : > { %v1367_v0 = vsel %vm1178_vm4, %v1266_v63, -inf }
 0x477   : > { %v1223_v1 = vpop.f32.mrf.mxu1  ;;  %1368 = vmax.xlane.f32.xlu1 %v1367_v0  ;;  %v2298_v2 = vpop.f32.mrf.mxu0 }
 0x479   : > { %v2293_v4 = vpop.f32.mrf.mxu1  ;;  %v1269_v5 = vpop.f32.mrf.mxu0 }
 0x47b   : > { %v2299_v6 = vpop.f32.mrf.mxu0 }
 0x47d   : > { %v2868_v7 = vpop.f32.mrf.mxu0 }
 0x47e   : > { %v2870_v8 = vpop.f32.mrf.mxu1  ;;  %v1373_v17 = vsel %vm1178_vm4, %v2868_v7, -inf }
 0x47f   : > { %v2310_v9 = vpop.f32.mrf.mxu0  ;;  %v1370_v18 = vsel %vm1178_vm4, %v2870_v8, -inf }
 0x480   : > { %v2304_v10 = vpop.f32.mrf.mxu1 }
 0x481   : > { %v1361_v11 = vpop.f32.mrf.mxu0 }
 0x482   : > { %v1315_v13 = vpop.f32.mrf.mxu1 }
 0x483   : > { %v2311_v15 = vpop.f32.mrf.mxu0 }
 0x484   : > { %v2305_v16 = vpop.f32.mrf.mxu1 }
 0x488   : > { %676 = vrot.lane.b32.xlu1 %v2833_v19, %s2605_s23 }
 0x48b   : > { %678 = vrot.lane.b32.xlu0 %v2833_v19, %s2603_s21 }
 0x4aa   : > { %1374 = vmax.xlane.f32.xlu0 %v1373_v17 }
 0x4ac   : > { %1371 = vmax.xlane.f32.xlu1 %v1370_v18 }
 0x4fe   : > { %v1366_v21 = vpop.xlane.xlu0 %1365 }
 0x4ff   : > { %v1376_v22 = vsub.f32 %v1220_v60, %v1366_v21 }
 0x500   : > { %v1369_v25 = vpop.xlane.xlu1 %1368 }
 0x501   : > { %v1380_v28 = vmul.f32 1.442695, %v1376_v22  ;;  %v1377_v29 = vsub.f32 %v1266_v63, %v1369_v25 }
 0x502   : > { %v679_v31 = vpop.permute.xlu0 %678 }
 0x503   : > { %2472 = vpow2.f32 %v1380_v28  ;;  %v1382_v34 = vmul.f32 1.442695, %v1377_v29  ;;  %v690_v37 = vshrl.u32 %v679_v31, 16 }
 0x504   : > { %v677_v36 = vpop.permute.xlu1 %676 }
 0x505   : > { %2474 = vpow2.f32 %v1382_v34  ;;  %v688_v38 = vpack.i.b16 %v679_v31, %v677_v36  ;;  %v689_v39 = vshrl.u32 %v677_v36, 16 }
 0x507   : > { %v691_v41 = vpack.i.b16 %v690_v37, %v689_v39  ;;  %v707_v42 = vrot.slane %v688_v38, %v2796_v3 }
 0x509   : > { %v708_v44 = vcombine.low %v699_v40, %v707_v42  ;;  %v709_v45 = vcombine.high %v699_v40, %v707_v42  ;;  %v741_v46 = vrot.slane %v691_v41, %v2796_v3 }
 0x50b   : > { %v716_v19 = vrot.slane %v708_v44, %v2799_v12  ;;  %v723_v47 = vrot.slane %v709_v45, %v2799_v12  ;;  %v742_v48 = vcombine.low %v733_v43, %v741_v46  ;;  %v743_v49 = vcombine.high %v733_v43, %v741_v46 }
 0x50d   : > { %v750_v50 = vrot.slane %v742_v48, %v2799_v12  ;;  %v757_v51 = vrot.slane %v743_v49, %v2799_v12  ;;  %v1404_v52 = vcombine.low %v716_v19, %v723_v47  ;;  %v2197_v53 = vcombine.high %v716_v19, %v723_v47 }
 0x50f   : > { %v1411_v54 = vrot.slane %v1404_v52, %v2796_v3  ;;  %v1419_v55 = vrot.slane %v2197_v53, %v2796_v3  ;;  %v1429_v56 = vcombine.low %v750_v50, %v757_v51  ;;  %v2198_v57 = vcombine.high %v750_v50, %v757_v51 }
 0x510   : > { %v2473_v58 = vpop.eup %2472 }
 0x511   : > { %v1436_v33 = vrot.slane %v1429_v56, %v2796_v3  ;;  %v1444_v59 = vrot.slane %v2198_v57, %v2796_v3  ;;  %v1388_v60 = vsel %vm1178_vm4, %v2473_v58, 0.0  ;;  %v1420_v61 = vcombine.low %v1411_v54, %v1419_v55 }
 0x512   : > { %v2475_v62 = vpop.eup %2474  ;;  %1389 = vadd.xlane.f32.xlu0 %v1388_v60  ;;  %v1400_v20 = vpack.c.bf16 %v2473_v58, %v2473_v58 }
 0x513   : > { %v1391_v63 = vsel %vm1178_vm4, %v2475_v62, 0.0  ;;  %v1427_v0 = vrot.slane %v1420_v61, %v2799_v12  ;;  %v1445_v1 = vcombine.low %v1436_v33, %v1444_v59  ;;  %v1401_v23 = vpack.c.bf16 %v2475_v62, %v2475_v62 }
 0x514   : > { %1392 = vadd.xlane.f32.xlu1 %v1391_v63 }
 0x515   : > { %v1452_v2 = vrot.slane %v1445_v1, %v2799_v12  ;;  %v1428_v4 = vcombine.high %v1427_v0, %v2608_v27  ;;  %v1457_v6 = vshrl.u32 %v1427_v0, 16 }
 0x517   : > { %v1456_v5 = vpack.i.b16 %v1452_v2, %v1427_v0  ;;  %v1458_v9 = vshrl.u32 %v1452_v2, 16  ;;  %v1453_v10 = vcombine.high %v1452_v2, %v2608_v27  ;;  %v1463_v11 = vshrl.u32 %v1428_v4, 16 }
 0x519   : > { %v1470_v13 = vsel %vm1182_vm3, %v1456_v5, 0  ;;  %v1459_v15 = vpack.i.b16 %v1458_v9, %v1457_v6  ;;  %v1462_v16 = vpack.i.b16 %v1453_v10, %v1428_v4  ;;  %v1464_v17 = vshrl.u32 %v1453_v10, 16 }
 0x51a   : > { %2313 = vmatpush3.bf16.msra.mxu1 %v1470_v13 }
 0x51b   : > { %v1516_v18 = vsel %vm1182_vm3, %v1459_v15, 0  ;;  %2324 = vmatprep.subr.bf16.mxu1 %v2600_v14  ;;  %v1465_v21 = vpack.i.b16 %v1464_v17, %v1463_v11  ;;  %v1562_v22 = vsel %vm1182_vm3, %v1462_v16, 0  ;;  %v2456_v17 = vld [vmem:[%s3067_s5 + $0x8] sm:$0xff]  }
 0x51c   : > { %2319 = vmatpush3.bf16.msra.mxu0 %v1516_v18 }
 0x51d   : > { %2315 = vmatmul.mubr.msk.bf16.vlgmr.msra.gmra.mxu1 %vm1178_vm4, %v1400_v20  ;;  %2330 = vmatprep.subr.bf16.mxu0 %v2600_v14  ;;  %v1608_v27 = vsel %vm1182_vm3, %v1465_v21, 0 }
 0x51e   : > { %2325 = vmatpush3.bf16.msra.mxu1 %v1562_v22  ;;  %2326 = vmatprep.mubr.msk.bf16.mxu1 %vm2601_vm1, %v2600_v14 }
 0x51f   : > { %2321 = vmatmul.mubr.msk.bf16.vlgmr.msra.gmra.mxu0 %vm1178_vm4, %v1401_v23  ;;  %2336 = vmatprep.subr.bf16.mxu1 %v2600_v14 }
 0x520   : > { %2331 = vmatpush3.bf16.msra.mxu0 %v1608_v27  ;;  %2332 = vmatprep.mubr.msk.bf16.mxu0 %vm2601_vm1, %v2600_v14 }
 0x521   : > { %2344 = vmatprep.subr.bf16.mxu0 %v2600_v14 }
 0x533   : > { %v1375_v25 = vpop.xlane.xlu0 %1374 }
 0x534   : > { %v1379_v28 = vsub.f32 %v2868_v7, %v1375_v25 }
 0x535   : > { %v1372_v29 = vpop.xlane.xlu1 %1371 }
 0x536   : > { %v1386_v30 = vmul.f32 1.442695, %v1379_v28  ;;  %v1378_v31 = vsub.f32 %v2870_v8, %v1372_v29  ;;  %v2457_v29 = vld [vmem:[%s3067_s5] sm:$0xff]  }
 0x538   : > { %2476 = vpow2.f32 %v1386_v30  ;;  %v1384_v32 = vmul.f32 1.442695, %v1378_v31 }
 0x53a   : > { %2478 = vpow2.f32 %v1384_v32 }
 0x545   : > { %v2477_v34 = vpop.eup %2476 }
 0x546   : > { %v1397_v35 = vsel %vm1178_vm4, %v2477_v34, 0.0  ;;  %v1403_v36 = vpack.c.bf16 %v2477_v34, %v2477_v34 }
 0x547   : > { %v2479_v37 = vpop.eup %2478  ;;  %1398 = vadd.xlane.f32.xlu1 %v1397_v35 }
 0x548   : > { %2333 = vmatmul.mubr.msk.bf16.vlgmr.msra.gmra.mxu0 %vm1178_vm4, %v1403_v36  ;;  %v1394_v38 = vsel %vm1178_vm4, %v2479_v37, 0.0  ;;  %v1402_v39 = vpack.c.bf16 %v2479_v37, %v2479_v37 }
 0x549   : > { %1395 = vadd.xlane.f32.xlu0 %v1394_v38  ;;  %2348 = vmatprep.mubr.msk.bf16.mxu0 %vm2601_vm1, %v2600_v14 }
 0x54a   : > { %2327 = vmatmul.mubr.msk.bf16.vlgmr.msra.gmra.mxu1 %vm1178_vm4, %v1402_v39 }
 0x54b   : > { %2340 = vmatprep.mubr.msk.bf16.mxu1 %vm2601_vm1, %v2600_v14  ;;  %2337 = vmatpush3.bf16.msra.mxu1 %v2456_v17 }
 0x54c   : > { %2338 = vmatprep.subr.bf16.mxu1 %v2600_v14 }
 0x54f   : > { %2339 = vmatpush3.bf16.msra.mxu1 %v2457_v29  ;;  %v2208_v29 = vld [vmem:[%s3064_s2] ss:$0 sm:$0xff] }
 0x550   : > { %2352 = vmatprep.subr.bf16.mxu1 %v2600_v14 }
 0x59b   : > { %v1390_v19 = vpop.xlane.xlu0 %1389 }
 0x59d   : > { %v1393_v46 = vpop.xlane.xlu1 %1392 }
 0x59e   : > { %2480 = vrcp.f32 %v1393_v46 }
 0x5ab   : > { %v2481_v49 = vpop.eup %2480 }
 0x5d0   : > { %v1399_v47 = vpop.xlane.xlu1 %1398 }
 0x5d1   : > { %2482 = vrcp.f32 %v1399_v47 }
 0x5d2   : > { %v1396_v48 = vpop.xlane.xlu0 %1395  ;;  %2484 = vrcp.f32 %v1390_v19 }
 0x5d3   : > { %2486 = vrcp.f32 %v1396_v48 }
 0x5dd   : > { %v1506_v7 = vpop.f32.mrf.mxu1 }
 0x5de   : > { %v2483_v50 = vpop.eup %2482 }
 0x5df   : > { %v2316_v8 = vpop.f32.mrf.mxu1  ;;  %v1552_v40 = vpop.f32.mrf.mxu0 }
 0x5e0   : > { %v2485_v52 = vpop.eup %2484  ;;  %v1655_v53 = vmul.f32 %v2481_v49, %v1552_v40  ;;  %v1818_v49 = vsub.s32 2, %v2765_v24 }
 0x5e1   : > { %v1509_v41 = vpop.f32.mrf.mxu1  ;;  %v2322_v42 = vpop.f32.mrf.mxu0  ;;  %v1654_v58 = vmul.f32 %v2485_v52, %v1506_v7 }
 0x5e2   : > { %v2487_v55 = vpop.eup %2486 }
 0x5e3   : > { %v2317_v43 = vpop.f32.mrf.mxu1  ;;  %v1555_v44 = vpop.f32.mrf.mxu0 }
 0x5e5   : > { %v2323_v45 = vpop.f32.mrf.mxu0 }
 0x608   : > { %v1644_v51 = vpop.f32.mrf.mxu0 }
 0x609   : > { %v1657_v54 = vmul.f32 %v2483_v50, %v1644_v51  ;;  %v1819_v50 = vrot.slane %v2768_v26, %v1818_v49 }
 0x60a   : > { %v1598_v56 = vpop.f32.mrf.mxu1  ;;  %v2334_v57 = vpop.f32.mrf.mxu0 }
 0x60b   : > { %v1674_v33 = vcombine.low %v1655_v53, %v1657_v54  ;;  %v1675_v59 = vcombine.high %v1655_v53, %v1657_v54  ;;  %v1656_v60 = vmul.f32 %v2487_v55, %v1598_v56  ;;  %v2490_v54 = vld [vmem:[%s2739_s16] sm:$0xff] }
 0x60c   : > { %v2328_v61 = vpop.f32.mrf.mxu1  ;;  %v1647_v62 = vpop.f32.mrf.mxu0 }
 0x60d   : > { %v1658_v63 = vcombine.low %v1654_v58, %v1656_v60  ;;  %v1659_v0 = vcombine.high %v1654_v58, %v1656_v60  ;;  %v1682_v4 = vrot.slane %v1674_v33, %v2796_v3  ;;  %v1689_v5 = vrot.slane %v1675_v59, %v2796_v3 }
 0x60e   : > { %v1601_v1 = vpop.f32.mrf.mxu1  ;;  %v2335_v2 = vpop.f32.mrf.mxu0 }
 0x60f   : > { %v1666_v6 = vrot.slane %v1658_v63, %v2796_v3  ;;  %v1673_v9 = vrot.slane %v1659_v0, %v2796_v3  ;;  %v2458_v63 = vld [vmem:[%s3068_s6 + $0x8] sm:$0xff]   ;;  %v2459_v0 = vld [vmem:[%s3068_s6] sm:$0xff]   ;;  %v2460_v1 = vld [vmem:[%s3069_s7 + $0x38] sm:$0xff]  }
 0x610   : > { %v2329_v10 = vpop.f32.mrf.mxu1  ;;  %2345 = vmatpush3.bf16.msra.mxu0 %v2458_v63  ;;  %v2461_v2 = vld [vmem:[%s3069_s7 + $0x30] sm:$0xff]  }
 0x611   : > { %v1690_v11 = vcombine.low %v1666_v6, %v1682_v4  ;;  %v1691_v13 = vcombine.high %v1666_v6, %v1682_v4  ;;  %v1706_v15 = vcombine.low %v1673_v9, %v1689_v5  ;;  %v1707_v16 = vcombine.high %v1673_v9, %v1689_v5  ;;  %2346 = vmatprep.subr.bf16.mxu0 %v2600_v14  ;;  %v2462_v4 = vld [vmem:[%s3069_s7 + $0x28] sm:$0xff]   ;;  %v2463_v5 = vld [vmem:[%s3069_s7 + $0x20] sm:$0xff]   ;;  %v2464_v6 = vld [vmem:[%s3069_s7 + $0x18] sm:$0xff]  }
 0x612   : > { %v2465_v9 = vld [vmem:[%s3069_s7 + $0x10] sm:$0xff]  }
 0x613   : > { %v1698_v18 = vrot.slane %v1690_v11, %v2799_v12  ;;  %v1705_v20 = vrot.slane %v1691_v13, %v2799_v12  ;;  %v1714_v21 = vrot.slane %v1706_v15, %v2799_v12  ;;  %v1721_v22 = vrot.slane %v1707_v16, %v2799_v12 }
 0x614   : > { %2347 = vmatpush3.bf16.msra.mxu0 %v2459_v0  ;;  %v1891_v15 = vsub.s32 3, %v2765_v24  ;;  %v1896_v16 = vsub.s32 4, %v2765_v24 }
 0x615   : > { %v1726_v23 = vcombine.low %v1698_v18, %v1705_v20  ;;  %v2203_v27 = vcombine.high %v1698_v18, %v1705_v20  ;;  %v1742_v25 = vcombine.low %v1714_v21, %v1721_v22  ;;  %v2204_v28 = vcombine.high %v1714_v21, %v1721_v22 }
 0x616   : > { %v1892_v17 = vrot.slane %v2768_v26, %v1891_v15  ;;  %v1897_v21 = vrot.slane %v2768_v26, %v1896_v16 }
 0x617   : > { %v1733_v30 = vrot.slane %v1726_v23, %v2796_v3  ;;  %v1741_v31 = vrot.slane %v2203_v27, %v2796_v3  ;;  %v1749_v32 = vrot.slane %v1742_v25, %v2796_v3  ;;  %v1757_v34 = vrot.slane %v2204_v28, %v2796_v3  ;;  %v2466_v25 = vld [vmem:[%s3069_s7 + $0x8] sm:$0xff]   ;;  %v2467_v28 = vld [vmem:[%s3069_s7] sm:$0xff]  }
 0x619   : > { %v1759_v35 = vcombine.high %v1733_v30, %v1741_v31  ;;  %v1775_v36 = vcombine.high %v1749_v32, %v1757_v34  ;;  %v1758_v37 = vcombine.low %v1733_v30, %v1741_v31  ;;  %v1774_v38 = vcombine.low %v1749_v32, %v1757_v34 }
 0x61b   : > { %v1773_v39 = vrot.slane %v1759_v35, %v2799_v12  ;;  %v1789_v7 = vrot.slane %v1775_v36, %v2799_v12  ;;  %v1766_v8 = vrot.slane %v1758_v37, %v2799_v12  ;;  %v1782_v40 = vrot.slane %v1774_v38, %v2799_v12 }
 0x61d   : > { %v1792_v41 = vcombine.low %v1773_v39, %v1789_v7  ;;  %v1791_v42 = vcombine.high %v1766_v8, %v1782_v40  ;;  %v1790_v43 = vcombine.low %v1766_v8, %v1782_v40  ;;  %v1793_v3 = vcombine.high %v1773_v39, %v1789_v7 }
 0x61f   : > { %1799 = vrot.lane.b32.xlu1 %v1792_v41, %s2609_s12  ;;  %1795 = vrot.lane.b32.xlu0 %v1791_v42, %s2610_s14  ;;  %s321_s14 = sand.u32 1, %s2581_s28   ;;  %s2523_s12 = scalar_lea.vmem %s2522_s11, 256 }
 0x620   : > { %s2079_s30 = scalar_lea.sflag [#allocation5], %s321_s14 }
 0x623   : > { %1803 = vrot.lane.b32.xlu1 %v1793_v3, %s2611_s19  ;;  %s2182_s19 = sshll.u32 %s321_s14, 3 }
 0x624   : > { %s323_s21 = scalar_lea.vmem [#allocation6], %s2182_s19 }
 0x625   : > { %s2093_s16 = sshll.u32 %s323_s21, 4  ;;  %s3017_s16 = int_to_ptr.vmem [resolvable:$true] %s2093_s16 }
 0x626   : > { %s2517_s25 = scalar_lea.vmem %s3017_s16, 128  ;;  %p2524_p0 = scmp.lt.s32.totalorder %s3017_s16, %s2522_s11 }
 0x627   : > { %p2518_p10 = scmp.ne.s32.totalorder %s3017_s16, %s2517_s25  ;;  %p2525_p1 = scmp.lt.s32.totalorder %s2523_s12, %s2517_s25 }
 0x629   : > { %p2519_p11 = pnand %p2518_p10, %p2698_p4  ;;  %p2526_p2 = por %p2525_p1, %p2524_p0 }
 0x62b   : > { %p2520_p13 = pneg %p2519_p11 }
 0x62d   : > { %p2527_p3 = pnand %p2526_p2, %p2520_p13 }
 0x691   : > { %v1800_v44 = vpop.permute.xlu1 %1799  ;;  %v1796_v45 = vpop.permute.xlu0 %1795 }
 0x692   : > { %v1806_v46 = vsel %vm1178_vm4, %v1790_v43, %v1796_v45 }
 0x693   : > { %v1808_v47 = vsel %vm1807_vm5, %v1806_v46, %v1800_v44 }
 0x695   : > { %v1804_v19 = vpop.permute.xlu1 %1803 }
 0x696   : > { %v1810_v12 = vsel %vm1809_vm6, %v1808_v47, %v1804_v19 }
 0x697   : > { %v1811_v48 = vpack.c.bf16 %v1810_v12, %v1810_v12 }
 0x699   : > { %2341 = vmatmul.mubr.msk.bf16.vlgmr.msra.gmra.mxu1 %vm335_vm0, %v1811_v48 }
 0x69a   : > { %2368 = vmatprep.mubr.msk.bf16.mxu1 %vm2601_vm1, %v2600_v14  ;;  %2353 = vmatpush3.bf16.msra.mxu1 %v2460_v1 }
 0x69b   : > { %2354 = vmatprep.subr.bf16.mxu1 %v2600_v14 }
 0x69e   : > { %2355 = vmatpush3.bf16.msra.mxu1 %v2461_v2 }
 0x69f   : > { %2356 = vmatprep.subr.bf16.mxu1 %v2600_v14 }
 0x6a2   : > { %2357 = vmatpush3.bf16.msra.mxu1 %v2462_v4 }
 0x6a3   : > { %2358 = vmatprep.subr.bf16.mxu1 %v2600_v14 }
 0x6a6   : > { %2359 = vmatpush3.bf16.msra.mxu1 %v2463_v5 }
 0x6a7   : > { %2360 = vmatprep.subr.bf16.mxu1 %v2600_v14 }
 0x6aa   : > { %2361 = vmatpush3.bf16.msra.mxu1 %v2464_v6 }
 0x6ab   : > { %2362 = vmatprep.subr.bf16.mxu1 %v2600_v14 }
 0x6ae   : > { %2363 = vmatpush3.bf16.msra.mxu1 %v2465_v9 }
 0x6af   : > { %2364 = vmatprep.subr.bf16.mxu1 %v2600_v14 }
 0x6b2   : > { %2365 = vmatpush3.bf16.msra.mxu1 %v2466_v25 }
 0x6b3   : > { %2366 = vmatprep.subr.bf16.mxu1 %v2600_v14  ;;  %v1986_v14 = vsub.s32 5, %v2765_v24 }
 0x6b5   : > { %v1987_v38 = vrot.slane %v2768_v26, %v1986_v14 }
 0x6b6   : > { %2367 = vmatpush3.bf16.msra.mxu1 %v2467_v28 }
 0x759   : > { %v1869_v51 = vpop.f32.mrf.mxu1 }
 0x75a   : > { %v1870_v52 = vadd.f32 %v1869_v51, %v1819_v50 }
 0x75b   : > { %v2342_v53 = vpop.f32.mrf.mxu1 }
 0x75c   : > { %v2955_v55 = vadd.f32 %v2490_v54, %v1870_v52 }
 0x75d   : > { %v1872_v56 = vpop.f32.mrf.mxu1 }
 0x75e   : > { %v1876_v57 = vsel %vm335_vm0, %v2955_v55, 0.0 }
 0x75f   : > { %1877 = vadd.xlane.f32.xlu0 %v1876_v57  ;;  %v2343_v58 = vpop.f32.mrf.mxu1 }
 0x7e8   : > { %v1878_v33 = vpop.xlane.xlu0 %1877 }
 0x7e9   : > { %v1879_v59 = vmul.f32 0.03125, %v1878_v33 }
 0x7eb   : > { %v1880_v60 = vsub.f32 %v2955_v55, %v1879_v59 }
 0x7ed   : > { %v1881_v61 = vmul.f32 %v1880_v60, %v1880_v60 }
 0x7ef   : > { %v1882_v62 = vsel %vm335_vm0, %v1881_v61, 0.0 }
 0x7f0   : > { %1883 = vadd.xlane.f32.xlu1 %v1882_v62 }
 0x879   : > { %v1884_v10 = vpop.xlane.xlu1 %1883 }
 0x87a   : > { %v1885_v11 = vmul.f32 0.03125, %v1884_v10 }
 0x87c   : > { %v1886_v13 = vadd.f32 1e-05, %v1885_v11 }
 0x87e   : > { %2488 = vrsqrt.f32 %v1886_v13 }
 0x88b   : > { %v2489_v18 = vpop.eup %2488 }
 0x88c   : > { %v1888_v20 = vmul.f32 %v2489_v18, %v1880_v60 }
 0x88e   : > { %v1893_v22 = vmul.f32 %v1892_v17, %v1888_v20 }
 0x890   : > { %v1898_v23 = vadd.f32 %v1897_v21, %v1893_v22 }
 0x892   : > { %v1899_v27 = vpack.c.bf16 %v1898_v23, %v1898_v23 }
 0x894   : > { %2349 = vmatmul.mubr.msk.bf16.vlgmr.msra.gmra.mxu0 %vm335_vm0, %v1899_v27 }
 0x954   : > { %v1960_v30 = vpop.f32.mrf.mxu0 }
 0x955   : > { %v1961_v31 = vadd.f32 %v2208_v29, %v1960_v30 }
 0x956   : > { %v2350_v32 = vpop.f32.mrf.mxu0 }
 0x957   : > { %v1966_v34 = vmax.f32 %v1961_v31, 0.0 }
 0x958   : > { %v1963_v35 = vpop.f32.mrf.mxu0 }
 0x959   : > { %v1967_v36 = vpack.c.bf16 %v1966_v34, %v1966_v34 }
 0x95a   : > { %v2351_v37 = vpop.f32.mrf.mxu0 }
 0x95b   : > { %2369 = vmatmul.mubr.bf16.vlgmr.msra.gmra.mxu1 %v1967_v36 }
 0xa1b   : > { %v2070_v39 = vpop.f32.mrf.mxu1 }
 0xa1c   : > { %v2071_v7 = vadd.f32 %v2070_v39, %v1987_v38 }
 0xa1d   : > { %v2370_v8 = vpop.f32.mrf.mxu1 }
 0xa1e   : > { %v2076_v40 = vadd.f32 %v2071_v7, %v2955_v55 }
 0xa1f   : > { %v2073_v24 = vpop.f32.mrf.mxu1 }
 0xa20   : > { %2077 = vst.msk [vmem:[%s323_s21] sm:$0xff] %vm335_vm0, %v2076_v40 }
 0xa21   : > { %v2371_v26 = vpop.f32.mrf.mxu1 }
 0xa22   : > { %2530 = shalt.err (!%p2527_p3)
}
 0xa23   : > { %s2531_s19 = scalar_lea.hbm %s3015_s24, 128  ;;  %s2535_s21 = scalar_lea.hbm %s3070_s8, 256 }
 0xa24   : > { %p2532_p5 = scmp.ne.s32.totalorder %s3015_s24, %s2531_s19  ;;  %p2536_p9 = scmp.lt.s32.totalorder %s3015_s24, %s3070_s8 }
 0xa25   : > { %p2537_p12 = scmp.lt.s32.totalorder %s2535_s21, %s2531_s19 }
 0xa26   : > { %p2533_p6 = pnand %p2532_p5, %p2698_p4 }
 0xa27   : > { %p2538_p10 = por %p2537_p12, %p2536_p9 }
 0xa28   : > { %p2534_p7 = pneg %p2533_p6 }
 0xa2a   : > { %p2539_p11 = pnand %p2538_p10, %p2534_p7 }
 0xa2c   : > { %2542 = shalt.err (!%p2539_p11)
}
 0xa2d   : > { %2376 = dma.vmem_to_hbm [thread:$0]  (%p2698_p4), %s3017_s16, 128, %s3015_s24, %s2079_s30  }
 0xa2e PF: > { %p2388_p13 = scmp.ge.s32.totalorder %s2597_s10, 2  ;;  %s2105_s25 = sand.u32 1, %s2577_s27  }
 0xa2f   : > { %s2106_s26 = scalar_lea.sflag [#allocation5], %s2105_s25 }
 0xa30   : > { %p2383_p0 = pnand %p2388_p13, %p2705_p8 }
 0xa32   : > { %p2384_p1 = pneg %p2383_p0 }
 0xa34   : > { %2572 = dma.done.wait (%p2384_p1), %s2106_s26, 128  }
 0xa35   : > { %2574 = vsyncadd (%p2384_p1), %s2106_s26, 4294967168  ;;  %s22_s10 = sadd.s32 1, %s2597_s10   ;;  %s3075_s27 = smov %s2581_s28 }
 0xa36   : > { %p19_p2 = scmp.ge.s32.totalorder %s22_s10, 4   ;;  %s3076_s28 = smov %s2585_s29 }
 0xa37   : > { %s3077_s29 = smov %s2711_s18  ;;  %s3078_s30 = smov %s2593_s9 }
 0xa38   : > { %s3079_s9 = smov %s3081_s13  ;;  %21 = sbr.rel (!%p19_p2) target bundleno = 5 (0x5), region = 99 }
 0xa3d   :  { %2111 = vsyncpa [#allocation4], 1 }
 0xa3e   :  { %2113 = vsyncpa [#allocation4 + $0x1], 1 }
 0xa3f   :  { %2114 = vsyncpa [#allocation5], 1 }
 0xa40   :  { %2116 = vsyncpa [#allocation5 + $0x1], 1 }

</bundles_post_ra>
